<compile_context>
chip_gen: v6e
topology: v6e:2x2x1
jax: 0.10.0
libtpu: 0.0.40
codegen_flags: <defaults>
</compile_context>

<pallas_src>
import functools

import jax
import jax.numpy as jnp
from jax.experimental import pallas as pl
from jax.experimental.pallas import tpu as pltpu

KSIZE = 5
PAD = 2


# ----------------------------------------------------------------------------
# in-kernel helpers (traced inside the Pallas kernel)
# ----------------------------------------------------------------------------
def _zero_halo(xpad_ref, h_out, w_out, c):
    """Zero only the 2-wide halo of a padded (bn, H+4, (W+4)*c) scratch."""
    n, hp, wcp = xpad_ref.shape
    xpad_ref[:, :PAD, :] = jnp.zeros((n, PAD, wcp), jnp.float32)
    xpad_ref[:, PAD + h_out:, :] = jnp.zeros((n, hp - PAD - h_out, wcp), jnp.float32)
    xpad_ref[:, :, :PAD * c] = jnp.zeros((n, hp, PAD * c), jnp.float32)
    xpad_ref[:, :, (PAD + w_out) * c:] = jnp.zeros(
        (n, hp, wcp - (PAD + w_out) * c), jnp.float32)


def _banded_conv_relu(xpad_ref, wb_ref, bias_ref, n, h_out):
    """5x5 'same' conv + bias + ReLU as 5 banded MXU matmuls (one per kh).

    xpad_ref: (n, H+4, (W+4)*cin) zero-padded input, lanes ordered (w, cin)
    wb_ref:   (5, (W+4)*cin, W*cout) banded weights (Toeplitz over w)
    bias_ref: (1, W*cout) bias tiled over w
    returns:  (n*H, W*cout) float32, rows (b, h) b-major, lanes (w, cout)
    """
    k_lanes = xpad_ref.shape[-1]
    acc = None
    for kh in range(KSIZE):
        a = xpad_ref[:, kh:kh + h_out, :].reshape(n * h_out, k_lanes)
        d = jnp.dot(a, wb_ref[kh], preferred_element_type=jnp.float32)
        acc = d if acc is None else acc + d
    return jnp.maximum(acc + bias_ref[...], 0.0)


def _maxpool2x2_wc(y, w_in, c):
    """2x2 / stride-2 max pool for (rows=(b,h), lanes=(w,c)) activations.

    y: (rows, w_in*c) with rows b-major, h-minor (h_in even); returns
    (rows//2, (w_in//2)*c) with the same (w, c) lane ordering.
    """
    rows = y.shape[0]
    # pool along h: adjacent row pairs belong to the same image (H is even)
    yh = y.reshape(rows // 2, 2, w_in * c)
    yh = jnp.maximum(yh[:, 0, :], yh[:, 1, :])
    # pool along w: neighbour-block max then compact the even-w blocks
    m = jnp.maximum(yh[:, :(w_in - 1) * c], yh[:, c:])
    return jnp.concatenate(
        [m[:, (2 * i) * c:(2 * i) * c + c] for i in range(w_in // 2)], axis=-1)


def _cn_fused_kernel(x_ref, wb1_ref, b1_ref, wb2_ref, b2_ref, wfc_ref, bfc_ref,
                     o_ref, xpad1_ref, xpad2_ref, *, H, W, cin, c1, c2):
    # x_ref:   (bn, H, W*cin)             NHWC input, (w, c) fused on lanes
    # wb1_ref: (5, (W+4)*cin, W*c1)       conv1 banded weights
    # b1_ref:  (1, W*c1)
    # wb2_ref: (5, (W/2+4)*c1, (W/2)*c2)  conv2 banded weights
    # b2_ref:  (1, (W/2)*c2)
    # wfc_ref: (H/4*W/4*c2, OUT)          FC weights in (h, w, c) flatten order
    # bfc_ref: (1, OUT)
    # o_ref:   (bn, 1, OUT)
    bn = x_ref.shape[0]
    H2, W2 = H // 2, W // 2
    H4, W4 = H // 4, W // 4
    out_dim = o_ref.shape[-1]

    # ---- conv1 + ReLU + 2x2 max pool ----
    _zero_halo(xpad1_ref, H, W, cin)
    xpad1_ref[:, PAD:PAD + H, PAD * cin:(PAD + W) * cin] = x_ref[...]
    y1 = _banded_conv_relu(xpad1_ref, wb1_ref, b1_ref, bn, H)    # (bn*H, W*c1)
    p1 = _maxpool2x2_wc(y1, W, c1)                               # (bn*H2, W2*c1)

    # ---- conv2 + ReLU + 2x2 max pool ----
    _zero_halo(xpad2_ref, H2, W2, c1)
    xpad2_ref[:, PAD:PAD + H2, PAD * c1:(PAD + W2) * c1] = (
        p1.reshape(bn, H2, W2 * c1))
    y2 = _banded_conv_relu(xpad2_ref, wb2_ref, b2_ref, bn, H2)   # (bn*H2, W2*c2)
    p2 = _maxpool2x2_wc(y2, W2, c2)                              # (bn*H4, W4*c2)

    # ---- flatten to (h, w, c) lane order + single FC matmul ----
    p2_3 = p2.reshape(bn, H4, W4 * c2)
    flat = jnp.concatenate([p2_3[:, h, :] for h in range(H4)], axis=-1)
    out = jnp.dot(flat, wfc_ref[...],
                  preferred_element_type=jnp.float32) + bfc_ref[...]
    o_ref[...] = out.reshape(bn, 1, out_dim)


# ----------------------------------------------------------------------------
# wrapper
# ----------------------------------------------------------------------------
@functools.partial(jax.jit, static_argnames=("bn",))
def cn_forward(x_nchw, wb1, b1t, wb2, b2t, wfcp, bfcr, *, bn):
    N, Cin, H, W = x_nchw.shape
    assert H % 4 == 0 and W % 4 == 0, "spatial dims must be divisible by 4"
    assert N % bn == 0, "batch must be divisible by the batch tile"
    C1 = wb1.shape[-1] // W
    C2 = wb2.shape[-1] // (W // 2)
    OUT = wfcp.shape[-1]

    # Single cheap layout op outside the kernel: NCHW -> (N, H, W*Cin) so the
    # fused (w, c) axis maps to TPU lanes inside the kernel.
    x3 = jnp.transpose(x_nchw, (0, 2, 3, 1)).reshape(N, H, W * Cin)
    x3 = x3.astype(jnp.float32)

    kernel = functools.partial(_cn_fused_kernel, H=H, W=W, cin=Cin, c1=C1, c2=C2)

    out = pl.pallas_call(
        kernel,
        out_shape=jax.ShapeDtypeStruct((N, 1, OUT), jnp.float32),
        grid_spec=pltpu.PrefetchScalarGridSpec(
            num_scalar_prefetch=0,
            grid=(N // bn,),
            in_specs=[
                pl.BlockSpec((bn, H, W * Cin), lambda i: (i, 0, 0)),
                pl.BlockSpec(wb1.shape, lambda i: (0, 0, 0)),
                pl.BlockSpec(b1t.shape, lambda i: (0, 0)),
                pl.BlockSpec(wb2.shape, lambda i: (0, 0, 0)),
                pl.BlockSpec(b2t.shape, lambda i: (0, 0)),
                pl.BlockSpec(wfcp.shape, lambda i: (0, 0)),
                pl.BlockSpec(bfcr.shape, lambda i: (0, 0)),
            ],
            out_specs=pl.BlockSpec((bn, 1, OUT), lambda i: (i, 0, 0)),
            scratch_shapes=[
                pltpu.VMEM((bn, H + 2 * PAD, (W + 2 * PAD) * Cin), jnp.float32),
                pltpu.VMEM((bn, H // 2 + 2 * PAD, (W // 2 + 2 * PAD) * C1),
                           jnp.float32),
            ],
        ),
        compiler_params=pltpu.CompilerParams(
            dimension_semantics=("parallel",)),
    )(x3, wb1, b1t, wb2, b2t, wfcp, bfcr)
    return out.reshape(N, OUT)


# ----------------------------------------------------------------------------
# init-time weight repacking
# ----------------------------------------------------------------------------
def _band_conv_weight(w, w_out_dim):
    """(Cout, Cin, 5, 5) torch conv weight -> (5, (W+4)*Cin, W*Cout) banded.

    Band kh maps a padded input row (lanes = (w_in, cin)) to an output row
    (lanes = (w_out, cout)); block (w_in, w_out) holds w[:, :, kh, w_in-w_out]
    when 0 <= w_in - w_out < 5, else zero.
    """
    cout, cin, kh_dim, kw_dim = w.shape
    w_in_dim = w_out_dim + 2 * PAD
    wo = jnp.arange(w_out_dim)
    bands = []
    for kh in range(kh_dim):
        m = jnp.zeros((w_in_dim, cin, w_out_dim, cout), jnp.float32)
        for kw in range(kw_dim):
            m = m.at[wo + kw, :, wo, :].set(w[:, :, kh, kw].T)  # (cin, cout)
        bands.append(m.reshape(w_in_dim * cin, w_out_dim * cout))
    return jnp.stack(bands, axis=0)


class CNPallas:
    """Pallas port of models/FCAE_exp.py::CN (forward pass only)."""

    def __init__(self, input_dims, output_dim, key, batch_tile=None):
        H, W, Cin = input_dims          # torch code: input_dims = (H, W, C)
        assert H % 4 == 0 and W % 4 == 0, "spatial dims must be divisible by 4"
        self.output_dim = output_dim
        self.com_height = H // 4
        self.com_width = W // 4
        self.batch_tile = batch_tile
        C1, C2 = 16, 6
        k1, k2, k3, k4, k5, k6 = jax.random.split(key, 6)

        # Deterministic synthetic parameters, PyTorch layout (Cout, Cin, kh, kw)
        self.w1 = 0.1 * jax.random.normal(k1, (C1, Cin, KSIZE, KSIZE), jnp.float32)
        self.b1 = 0.1 * jax.random.normal(k2, (C1,), jnp.float32)
        self.w2 = 0.1 * jax.random.normal(k3, (C2, C1, KSIZE, KSIZE), jnp.float32)
        self.b2 = 0.1 * jax.random.normal(k4, (C2,), jnp.float32)
        fc_in = C2 * self.com_height * self.com_width
        self.wfc = 0.1 * jax.random.normal(k5, (output_dim, fc_in), jnp.float32)
        self.bfc = 0.1 * jax.random.normal(k6, (output_dim,), jnp.float32)

        # ---- one-time weight repacking (init-time, not per forward) ----
        self.wb1 = _band_conv_weight(self.w1, W)            # (5, (W+4)*Cin, W*C1)
        self.b1t = jnp.tile(self.b1, W).reshape(1, W * C1)
        self.wb2 = _band_conv_weight(self.w2, W // 2)       # (5, (W/2+4)*C1, (W/2)*C2)
        self.b2t = jnp.tile(self.b2, W // 2).reshape(1, (W // 2) * C2)
        # FC weight permuted once so the kernel's (h, w, c) flatten order is
        # consumed directly (== torch NCHW x.view(l, 6*ch*cw) @ wfc.T + bfc).
        ch, cw = self.com_height, self.com_width
        self.wfcp = jnp.transpose(
            self.wfc.reshape(output_dim, C2, ch, cw), (2, 3, 1, 0)
        ).reshape(ch * cw * C2, output_dim)
        self.bfcr = self.bfc.reshape(1, output_dim)

    def _pick_bn(self, N):
        if self.batch_tile is not None:
            return self.batch_tile
        # Largest batch tile (fewest grid steps) is best on 1-TC chips; cap at
        # 128 samples/step so per-step VMEM stays modest even on v7x's 64 MiB.
        # For huge batches on v7x, pass batch_tile = N // 2 to keep 2 TCs fed.
        cap = min(N, 128)
        for bn in range(cap, 0, -1):
            if N % bn == 0:
                return bn
        return 1

    def __call__(self, x_nchw):
        bn = self._pick_bn(x_nchw.shape[0])
        return cn_forward(x_nchw, self.wb1, self.b1t, self.wb2, self.b2t,
                          self.wfcp, self.bfcr, bn=bn)


# ----------------------------------------------------------------------------
# pure-JAX reference (mirrors the torch module, NCHW throughout)
# ----------------------------------------------------------------------------
def _reference_forward(x_nchw, w1, b1, w2, b2, wfc, bfc):
    hi = jax.lax.Precision.HIGHEST

    def conv(x, w, b):
        y = jax.lax.conv_general_dilated(
            x, w, window_strides=(1, 1), padding=((PAD, PAD), (PAD, PAD)),
            dimension_numbers=("NCHW", "OIHW", "NCHW"), precision=hi)
        return jax.nn.relu(y + b.reshape(1, -1, 1, 1))

    def pool(x):
        return jax.lax.reduce_window(
            x, -jnp.inf, jax.lax.max, (1, 1, 2, 2), (1, 1, 2, 2), "VALID")

    y = pool(conv(x_nchw, w1, b1))
    y = pool(conv(y, w2, b2))
    y = y.reshape(y.shape[0], -1)            # NCHW flatten, matches torch .view
    return jnp.matmul(y, wfc.T, precision=hi) + bfc


if __name__ == "__main__":
    key = jax.random.PRNGKey(0)
    k_param, k_x = jax.random.split(key)

    input_dims = (16, 16, 4)   # (H, W, C) as expected by CN.__init__
    output_dim = 8
    batch = 2

    model = CNPallas(input_dims, output_dim, k_param)
    # PyTorch conv input is NCHW: (batch, C, H, W)
    x = jax.random.normal(
        k_x, (batch, input_dims[2], input_dims[0], input_dims[1]), jnp.float32)

    out = jax.block_until_ready(model(x))

    assert out.shape == (batch, output_dim), out.shape
    assert bool(jnp.all(jnp.isfinite(out)))

    ref = _reference_forward(x, model.w1, model.b1, model.w2, model.b2,
                             model.wfc, model.bfc)
    max_err = float(jnp.max(jnp.abs(out - ref)))
    assert bool(jnp.allclose(out, ref, rtol=2e-2, atol=2e-2)), max_err

    print("KERNEL_OK")
</pallas_src>

<mosaic_0001>
module attributes {stable_mosaic.version = 11 : i64} {
  func.func @_cn_fused_kernel(%arg0: i32, %arg1: memref<2x16x64xf32, #tpu.memory_space<vmem>>, %arg2: memref<5x80x256xf32, #tpu.memory_space<vmem>>, %arg3: memref<1x256xf32, #tpu.memory_space<vmem>>, %arg4: memref<5x192x48xf32, #tpu.memory_space<vmem>>, %arg5: memref<1x48xf32, #tpu.memory_space<vmem>>, %arg6: memref<96x8xf32, #tpu.memory_space<vmem>>, %arg7: memref<1x8xf32, #tpu.memory_space<vmem>>, %arg8: memref<2x1x8xf32, #tpu.memory_space<vmem>>, %arg9: memref<2x20x80xf32, #tpu.memory_space<vmem>>, %arg10: memref<2x12x192xf32, #tpu.memory_space<vmem>>) attributes {dimension_semantics = [#tpu.dimension_semantics<parallel>], iteration_bounds = array<i64: 1>, scalar_prefetch = 0 : i64, scratch_operands = 2 : i64, tpu.core_type = #tpu.core_type<tc>, window_params = [{transform_indices = @transform_0, window_bounds = array<i64: 2, 16, 64>}, {pipeline_mode = #tpu.pipeline_mode<synchronous>, transform_indices = @transform_1, window_bounds = array<i64: 5, 80, 256>}, {pipeline_mode = #tpu.pipeline_mode<synchronous>, transform_indices = @transform_2, window_bounds = array<i64: 1, 256>}, {pipeline_mode = #tpu.pipeline_mode<synchronous>, transform_indices = @transform_3, window_bounds = array<i64: 5, 192, 48>}, {pipeline_mode = #tpu.pipeline_mode<synchronous>, transform_indices = @transform_4, window_bounds = array<i64: 1, 48>}, {pipeline_mode = #tpu.pipeline_mode<synchronous>, transform_indices = @transform_5, window_bounds = array<i64: 96, 8>}, {pipeline_mode = #tpu.pipeline_mode<synchronous>, transform_indices = @transform_6, window_bounds = array<i64: 1, 8>}, {transform_indices = @transform_7, window_bounds = array<i64: 2, 1, 8>}]} {
    %cst = arith.constant 0.000000e+00 : f32
    %0 = vector.broadcast %cst : f32 to vector<2x2x80xf32>
    %c0 = arith.constant 0 : index
    %c0_0 = arith.constant 0 : index
    %c0_1 = arith.constant 0 : index
    %1 = vector.load %arg9[%c0, %c0_0, %c0_1] : memref<2x20x80xf32, #tpu.memory_space<vmem>>, vector<2x2x80xf32>
    tpu.vector_store %arg9[%c0, %c0_0, %c0_1], %0 {strides = array<i32>} : memref<2x20x80xf32, #tpu.memory_space<vmem>>, vector<2x2x80xf32>,
    %cst_2 = arith.constant 0.000000e+00 : f32
    %2 = vector.broadcast %cst_2 : f32 to vector<2x2x80xf32>
    %c0_3 = arith.constant 0 : index
    %c18 = arith.constant 18 : index
    %c0_4 = arith.constant 0 : index
    %3 = vector.load %arg9[%c0_3, %c18, %c0_4] : memref<2x20x80xf32, #tpu.memory_space<vmem>>, vector<2x2x80xf32>
    tpu.vector_store %arg9[%c0_3, %c18, %c0_4], %2 {strides = array<i32>} : memref<2x20x80xf32, #tpu.memory_space<vmem>>, vector<2x2x80xf32>,
    %cst_5 = arith.constant 0.000000e+00 : f32
    %4 = vector.broadcast %cst_5 : f32 to vector<2x20x8xf32>
    %c0_6 = arith.constant 0 : index
    %c0_7 = arith.constant 0 : index
    %c0_8 = arith.constant 0 : index
    %5 = vector.load %arg9[%c0_6, %c0_7, %c0_8] : memref<2x20x80xf32, #tpu.memory_space<vmem>>, vector<2x20x8xf32>
    tpu.vector_store %arg9[%c0_6, %c0_7, %c0_8], %4 {strides = array<i32>} : memref<2x20x80xf32, #tpu.memory_space<vmem>>, vector<2x20x8xf32>,
    %cst_9 = arith.constant 0.000000e+00 : f32
    %6 = vector.broadcast %cst_9 : f32 to vector<2x20x8xf32>
    %c0_10 = arith.constant 0 : index
    %c0_11 = arith.constant 0 : index
    %c72 = arith.constant 72 : index
    %7 = vector.load %arg9[%c0_10, %c0_11, %c72] : memref<2x20x80xf32, #tpu.memory_space<vmem>>, vector<2x20x8xf32>
    tpu.vector_store %arg9[%c0_10, %c0_11, %c72], %6 {strides = array<i32>} : memref<2x20x80xf32, #tpu.memory_space<vmem>>, vector<2x20x8xf32>,
    %c0_12 = arith.constant 0 : index
    %c0_13 = arith.constant 0 : index
    %c0_14 = arith.constant 0 : index
    %8 = vector.load %arg1[%c0_12, %c0_13, %c0_14] : memref<2x16x64xf32, #tpu.memory_space<vmem>>, vector<2x16x64xf32>
    %c0_15 = arith.constant 0 : index
    %c2 = arith.constant 2 : index
    %c8 = arith.constant 8 : index
    %9 = vector.load %arg9[%c0_15, %c2, %c8] : memref<2x20x80xf32, #tpu.memory_space<vmem>>, vector<2x16x64xf32>
    tpu.vector_store %arg9[%c0_15, %c2, %c8], %8 {strides = array<i32>} : memref<2x20x80xf32, #tpu.memory_space<vmem>>, vector<2x16x64xf32>,
    %c0_16 = arith.constant 0 : index
    %c0_17 = arith.constant 0 : index
    %c0_18 = arith.constant 0 : index
    %10 = vector.load %arg9[%c0_16, %c0_17, %c0_18] : memref<2x20x80xf32, #tpu.memory_space<vmem>>, vector<2x16x80xf32>
    %11 = vector.shape_cast %10 : vector<2x16x80xf32> to vector<32x80xf32>
    %c0_19 = arith.constant 0 : index
    %c0_20 = arith.constant 0 : index
    %c0_21 = arith.constant 0 : index
    %12 = vector.load %arg2[%c0_19, %c0_20, %c0_21] : memref<5x80x256xf32, #tpu.memory_space<vmem>>, vector<1x80x256xf32>
    %13 = vector.shape_cast %12 : vector<1x80x256xf32> to vector<80x256xf32>
    %cst_22 = arith.constant dense<0.000000e+00> : vector<32x256xf32>
    %14 = tpu.matmul %11, %13, %cst_22 {dimension_numbers = #tpu.dot_dimension_numbers<[1], [0], [0], [1], [0, 0, 1, 1], [], []>} : vector<32x80xf32>, vector<80x256xf32>, vector<32x256xf32> -> vector<32x256xf32>
    %c0_23 = arith.constant 0 : index
    %c1 = arith.constant 1 : index
    %c0_24 = arith.constant 0 : index
    %15 = vector.load %arg9[%c0_23, %c1, %c0_24] : memref<2x20x80xf32, #tpu.memory_space<vmem>>, vector<2x16x80xf32>
    %16 = vector.shape_cast %15 : vector<2x16x80xf32> to vector<32x80xf32>
    %c1_25 = arith.constant 1 : index
    %c0_26 = arith.constant 0 : index
    %c0_27 = arith.constant 0 : index
    %17 = vector.load %arg2[%c1_25, %c0_26, %c0_27] : memref<5x80x256xf32, #tpu.memory_space<vmem>>, vector<1x80x256xf32>
    %18 = vector.shape_cast %17 : vector<1x80x256xf32> to vector<80x256xf32>
    %cst_28 = arith.constant dense<0.000000e+00> : vector<32x256xf32>
    %19 = tpu.matmul %16, %18, %cst_28 {dimension_numbers = #tpu.dot_dimension_numbers<[1], [0], [0], [1], [0, 0, 1, 1], [], []>} : vector<32x80xf32>, vector<80x256xf32>, vector<32x256xf32> -> vector<32x256xf32>
    %20 = arith.addf %14, %19 : vector<32x256xf32>
    %c0_29 = arith.constant 0 : index
    %c2_30 = arith.constant 2 : index
    %c0_31 = arith.constant 0 : index
    %21 = vector.load %arg9[%c0_29, %c2_30, %c0_31] : memref<2x20x80xf32, #tpu.memory_space<vmem>>, vector<2x16x80xf32>
    %22 = vector.shape_cast %21 : vector<2x16x80xf32> to vector<32x80xf32>
    %c2_32 = arith.constant 2 : index
    %c0_33 = arith.constant 0 : index
    %c0_34 = arith.constant 0 : index
    %23 = vector.load %arg2[%c2_32, %c0_33, %c0_34] : memref<5x80x256xf32, #tpu.memory_space<vmem>>, vector<1x80x256xf32>
    %24 = vector.shape_cast %23 : vector<1x80x256xf32> to vector<80x256xf32>
    %cst_35 = arith.constant dense<0.000000e+00> : vector<32x256xf32>
    %25 = tpu.matmul %22, %24, %cst_35 {dimension_numbers = #tpu.dot_dimension_numbers<[1], [0], [0], [1], [0, 0, 1, 1], [], []>} : vector<32x80xf32>, vector<80x256xf32>, vector<32x256xf32> -> vector<32x256xf32>
    %26 = arith.addf %20, %25 : vector<32x256xf32>
    %c0_36 = arith.constant 0 : index
    %c3 = arith.constant 3 : index
    %c0_37 = arith.constant 0 : index
    %27 = vector.load %arg9[%c0_36, %c3, %c0_37] : memref<2x20x80xf32, #tpu.memory_space<vmem>>, vector<2x16x80xf32>
    %28 = vector.shape_cast %27 : vector<2x16x80xf32> to vector<32x80xf32>
    %c3_38 = arith.constant 3 : index
    %c0_39 = arith.constant 0 : index
    %c0_40 = arith.constant 0 : index
    %29 = vector.load %arg2[%c3_38, %c0_39, %c0_40] : memref<5x80x256xf32, #tpu.memory_space<vmem>>, vector<1x80x256xf32>
    %30 = vector.shape_cast %29 : vector<1x80x256xf32> to vector<80x256xf32>
    %cst_41 = arith.constant dense<0.000000e+00> : vector<32x256xf32>
    %31 = tpu.matmul %28, %30, %cst_41 {dimension_numbers = #tpu.dot_dimension_numbers<[1], [0], [0], [1], [0, 0, 1, 1], [], []>} : vector<32x80xf32>, vector<80x256xf32>, vector<32x256xf32> -> vector<32x256xf32>
    %32 = arith.addf %26, %31 : vector<32x256xf32>
    %c0_42 = arith.constant 0 : index
    %c4 = arith.constant 4 : index
    %c0_43 = arith.constant 0 : index
    %33 = vector.load %arg9[%c0_42, %c4, %c0_43] : memref<2x20x80xf32, #tpu.memory_space<vmem>>, vector<2x16x80xf32>
    %34 = vector.shape_cast %33 : vector<2x16x80xf32> to vector<32x80xf32>
    %c4_44 = arith.constant 4 : index
    %c0_45 = arith.constant 0 : index
    %c0_46 = arith.constant 0 : index
    %35 = vector.load %arg2[%c4_44, %c0_45, %c0_46] : memref<5x80x256xf32, #tpu.memory_space<vmem>>, vector<1x80x256xf32>
    %36 = vector.shape_cast %35 : vector<1x80x256xf32> to vector<80x256xf32>
    %cst_47 = arith.constant dense<0.000000e+00> : vector<32x256xf32>
    %37 = tpu.matmul %34, %36, %cst_47 {dimension_numbers = #tpu.dot_dimension_numbers<[1], [0], [0], [1], [0, 0, 1, 1], [], []>} : vector<32x80xf32>, vector<80x256xf32>, vector<32x256xf32> -> vector<32x256xf32>
    %38 = arith.addf %32, %37 : vector<32x256xf32>
    %c0_48 = arith.constant 0 : index
    %c0_49 = arith.constant 0 : index
    %39 = vector.load %arg3[%c0_48, %c0_49] : memref<1x256xf32, #tpu.memory_space<vmem>>, vector<1x256xf32>
    %40 = vector.broadcast %39 : vector<1x256xf32> to vector<32x256xf32>
    %41 = arith.addf %38, %40 : vector<32x256xf32>
    %cst_50 = arith.constant 0.000000e+00 : f32
    %42 = vector.broadcast %cst_50 : f32 to vector<32x256xf32>
    %43 = arith.maximumf %41, %42 : vector<32x256xf32>
    %44 = vector.shape_cast %43 : vector<32x256xf32> to vector<16x2x256xf32>
    %45 = vector.extract_strided_slice %44 {offsets = [0, 0, 0], sizes = [16, 1, 256], strides = [1, 1, 1]} : vector<16x2x256xf32> to vector<16x1x256xf32>
    %46 = vector.shape_cast %45 : vector<16x1x256xf32> to vector<16x256xf32>
    %47 = vector.extract_strided_slice %44 {offsets = [0, 1, 0], sizes = [16, 1, 256], strides = [1, 1, 1]} : vector<16x2x256xf32> to vector<16x1x256xf32>
    %48 = vector.shape_cast %47 : vector<16x1x256xf32> to vector<16x256xf32>
    %49 = arith.maximumf %46, %48 : vector<16x256xf32>
    %50 = vector.extract_strided_slice %49 {offsets = [0, 0], sizes = [16, 240], strides = [1, 1]} : vector<16x256xf32> to vector<16x240xf32>
    %51 = vector.extract_strided_slice %49 {offsets = [0, 16], sizes = [16, 240], strides = [1, 1]} : vector<16x256xf32> to vector<16x240xf32>
    %52 = arith.maximumf %50, %51 : vector<16x240xf32>
    %53 = vector.extract_strided_slice %52 {offsets = [0, 0], sizes = [16, 16], strides = [1, 1]} : vector<16x240xf32> to vector<16x16xf32>
    %54 = vector.extract_strided_slice %52 {offsets = [0, 32], sizes = [16, 16], strides = [1, 1]} : vector<16x240xf32> to vector<16x16xf32>
    %55 = vector.extract_strided_slice %52 {offsets = [0, 64], sizes = [16, 16], strides = [1, 1]} : vector<16x240xf32> to vector<16x16xf32>
    %56 = vector.extract_strided_slice %52 {offsets = [0, 96], sizes = [16, 16], strides = [1, 1]} : vector<16x240xf32> to vector<16x16xf32>
    %57 = vector.extract_strided_slice %52 {offsets = [0, 128], sizes = [16, 16], strides = [1, 1]} : vector<16x240xf32> to vector<16x16xf32>
    %58 = vector.extract_strided_slice %52 {offsets = [0, 160], sizes = [16, 16], strides = [1, 1]} : vector<16x240xf32> to vector<16x16xf32>
    %59 = vector.extract_strided_slice %52 {offsets = [0, 192], sizes = [16, 16], strides = [1, 1]} : vector<16x240xf32> to vector<16x16xf32>
    %60 = vector.extract_strided_slice %52 {offsets = [0, 224], sizes = [16, 16], strides = [1, 1]} : vector<16x240xf32> to vector<16x16xf32>
    %61 = tpu.concatenate %53, %54, %55, %56, %57, %58, %59, %60 in 1 : vector<16x16xf32>, vector<16x16xf32>, vector<16x16xf32>, vector<16x16xf32>, vector<16x16xf32>, vector<16x16xf32>, vector<16x16xf32>, vector<16x16xf32> -> vector<16x128xf32>
    %cst_51 = arith.constant 0.000000e+00 : f32
    %62 = vector.broadcast %cst_51 : f32 to vector<2x2x192xf32>
    %c0_52 = arith.constant 0 : index
    %c0_53 = arith.constant 0 : index
    %c0_54 = arith.constant 0 : index
    %63 = vector.load %arg10[%c0_52, %c0_53, %c0_54] : memref<2x12x192xf32, #tpu.memory_space<vmem>>, vector<2x2x192xf32>
    tpu.vector_store %arg10[%c0_52, %c0_53, %c0_54], %62 {strides = array<i32>} : memref<2x12x192xf32, #tpu.memory_space<vmem>>, vector<2x2x192xf32>,
    %cst_55 = arith.constant 0.000000e+00 : f32
    %64 = vector.broadcast %cst_55 : f32 to vector<2x2x192xf32>
    %c0_56 = arith.constant 0 : index
    %c10 = arith.constant 10 : index
    %c0_57 = arith.constant 0 : index
    %65 = vector.load %arg10[%c0_56, %c10, %c0_57] : memref<2x12x192xf32, #tpu.memory_space<vmem>>, vector<2x2x192xf32>
    tpu.vector_store %arg10[%c0_56, %c10, %c0_57], %64 {strides = array<i32>} : memref<2x12x192xf32, #tpu.memory_space<vmem>>, vector<2x2x192xf32>,
    %cst_58 = arith.constant 0.000000e+00 : f32
    %66 = vector.broadcast %cst_58 : f32 to vector<2x12x32xf32>
    %c0_59 = arith.constant 0 : index
    %c0_60 = arith.constant 0 : index
    %c0_61 = arith.constant 0 : index
    %67 = vector.load %arg10[%c0_59, %c0_60, %c0_61] : memref<2x12x192xf32, #tpu.memory_space<vmem>>, vector<2x12x32xf32>
    tpu.vector_store %arg10[%c0_59, %c0_60, %c0_61], %66 {strides = array<i32>} : memref<2x12x192xf32, #tpu.memory_space<vmem>>, vector<2x12x32xf32>,
    %cst_62 = arith.constant 0.000000e+00 : f32
    %68 = vector.broadcast %cst_62 : f32 to vector<2x12x32xf32>
    %c0_63 = arith.constant 0 : index
    %c0_64 = arith.constant 0 : index
    %c160 = arith.constant 160 : index
    %69 = vector.load %arg10[%c0_63, %c0_64, %c160] : memref<2x12x192xf32, #tpu.memory_space<vmem>>, vector<2x12x32xf32>
    tpu.vector_store %arg10[%c0_63, %c0_64, %c160], %68 {strides = array<i32>} : memref<2x12x192xf32, #tpu.memory_space<vmem>>, vector<2x12x32xf32>,
    %70 = vector.shape_cast %61 : vector<16x128xf32> to vector<2x8x128xf32>
    %c0_65 = arith.constant 0 : index
    %c2_66 = arith.constant 2 : index
    %c32 = arith.constant 32 : index
    %71 = vector.load %arg10[%c0_65, %c2_66, %c32] : memref<2x12x192xf32, #tpu.memory_space<vmem>>, vector<2x8x128xf32>
    tpu.vector_store %arg10[%c0_65, %c2_66, %c32], %70 {strides = array<i32>} : memref<2x12x192xf32, #tpu.memory_space<vmem>>, vector<2x8x128xf32>,
    %c0_67 = arith.constant 0 : index
    %c0_68 = arith.constant 0 : index
    %c0_69 = arith.constant 0 : index
    %72 = vector.load %arg10[%c0_67, %c0_68, %c0_69] : memref<2x12x192xf32, #tpu.memory_space<vmem>>, vector<2x8x192xf32>
    %73 = vector.shape_cast %72 : vector<2x8x192xf32> to vector<16x192xf32>
    %c0_70 = arith.constant 0 : index
    %c0_71 = arith.constant 0 : index
    %c0_72 = arith.constant 0 : index
    %74 = vector.load %arg4[%c0_70, %c0_71, %c0_72] : memref<5x192x48xf32, #tpu.memory_space<vmem>>, vector<1x192x48xf32>
    %75 = vector.shape_cast %74 : vector<1x192x48xf32> to vector<192x48xf32>
    %cst_73 = arith.constant dense<0.000000e+00> : vector<16x48xf32>
    %76 = tpu.matmul %73, %75, %cst_73 {dimension_numbers = #tpu.dot_dimension_numbers<[1], [0], [0], [1], [0, 0, 1, 1], [], []>} : vector<16x192xf32>, vector<192x48xf32>, vector<16x48xf32> -> vector<16x48xf32>
    %c0_74 = arith.constant 0 : index
    %c1_75 = arith.constant 1 : index
    %c0_76 = arith.constant 0 : index
    %77 = vector.load %arg10[%c0_74, %c1_75, %c0_76] : memref<2x12x192xf32, #tpu.memory_space<vmem>>, vector<2x8x192xf32>
    %78 = vector.shape_cast %77 : vector<2x8x192xf32> to vector<16x192xf32>
    %c1_77 = arith.constant 1 : index
    %c0_78 = arith.constant 0 : index
    %c0_79 = arith.constant 0 : index
    %79 = vector.load %arg4[%c1_77, %c0_78, %c0_79] : memref<5x192x48xf32, #tpu.memory_space<vmem>>, vector<1x192x48xf32>
    %80 = vector.shape_cast %79 : vector<1x192x48xf32> to vector<192x48xf32>
    %cst_80 = arith.constant dense<0.000000e+00> : vector<16x48xf32>
    %81 = tpu.matmul %78, %80, %cst_80 {dimension_numbers = #tpu.dot_dimension_numbers<[1], [0], [0], [1], [0, 0, 1, 1], [], []>} : vector<16x192xf32>, vector<192x48xf32>, vector<16x48xf32> -> vector<16x48xf32>
    %82 = arith.addf %76, %81 : vector<16x48xf32>
    %c0_81 = arith.constant 0 : index
    %c2_82 = arith.constant 2 : index
    %c0_83 = arith.constant 0 : index
    %83 = vector.load %arg10[%c0_81, %c2_82, %c0_83] : memref<2x12x192xf32, #tpu.memory_space<vmem>>, vector<2x8x192xf32>
    %84 = vector.shape_cast %83 : vector<2x8x192xf32> to vector<16x192xf32>
    %c2_84 = arith.constant 2 : index
    %c0_85 = arith.constant 0 : index
    %c0_86 = arith.constant 0 : index
    %85 = vector.load %arg4[%c2_84, %c0_85, %c0_86] : memref<5x192x48xf32, #tpu.memory_space<vmem>>, vector<1x192x48xf32>
    %86 = vector.shape_cast %85 : vector<1x192x48xf32> to vector<192x48xf32>
    %cst_87 = arith.constant dense<0.000000e+00> : vector<16x48xf32>
    %87 = tpu.matmul %84, %86, %cst_87 {dimension_numbers = #tpu.dot_dimension_numbers<[1], [0], [0], [1], [0, 0, 1, 1], [], []>} : vector<16x192xf32>, vector<192x48xf32>, vector<16x48xf32> -> vector<16x48xf32>
    %88 = arith.addf %82, %87 : vector<16x48xf32>
    %c0_88 = arith.constant 0 : index
    %c3_89 = arith.constant 3 : index
    %c0_90 = arith.constant 0 : index
    %89 = vector.load %arg10[%c0_88, %c3_89, %c0_90] : memref<2x12x192xf32, #tpu.memory_space<vmem>>, vector<2x8x192xf32>
    %90 = vector.shape_cast %89 : vector<2x8x192xf32> to vector<16x192xf32>
    %c3_91 = arith.constant 3 : index
    %c0_92 = arith.constant 0 : index
    %c0_93 = arith.constant 0 : index
    %91 = vector.load %arg4[%c3_91, %c0_92, %c0_93] : memref<5x192x48xf32, #tpu.memory_space<vmem>>, vector<1x192x48xf32>
    %92 = vector.shape_cast %91 : vector<1x192x48xf32> to vector<192x48xf32>
    %cst_94 = arith.constant dense<0.000000e+00> : vector<16x48xf32>
    %93 = tpu.matmul %90, %92, %cst_94 {dimension_numbers = #tpu.dot_dimension_numbers<[1], [0], [0], [1], [0, 0, 1, 1], [], []>} : vector<16x192xf32>, vector<192x48xf32>, vector<16x48xf32> -> vector<16x48xf32>
    %94 = arith.addf %88, %93 : vector<16x48xf32>
    %c0_95 = arith.constant 0 : index
    %c4_96 = arith.constant 4 : index
    %c0_97 = arith.constant 0 : index
    %95 = vector.load %arg10[%c0_95, %c4_96, %c0_97] : memref<2x12x192xf32, #tpu.memory_space<vmem>>, vector<2x8x192xf32>
    %96 = vector.shape_cast %95 : vector<2x8x192xf32> to vector<16x192xf32>
    %c4_98 = arith.constant 4 : index
    %c0_99 = arith.constant 0 : index
    %c0_100 = arith.constant 0 : index
    %97 = vector.load %arg4[%c4_98, %c0_99, %c0_100] : memref<5x192x48xf32, #tpu.memory_space<vmem>>, vector<1x192x48xf32>
    %98 = vector.shape_cast %97 : vector<1x192x48xf32> to vector<192x48xf32>
    %cst_101 = arith.constant dense<0.000000e+00> : vector<16x48xf32>
    %99 = tpu.matmul %96, %98, %cst_101 {dimension_numbers = #tpu.dot_dimension_numbers<[1], [0], [0], [1], [0, 0, 1, 1], [], []>} : vector<16x192xf32>, vector<192x48xf32>, vector<16x48xf32> -> vector<16x48xf32>
    %100 = arith.addf %94, %99 : vector<16x48xf32>
    %c0_102 = arith.constant 0 : index
    %c0_103 = arith.constant 0 : index
    %101 = vector.load %arg5[%c0_102, %c0_103] : memref<1x48xf32, #tpu.memory_space<vmem>>, vector<1x48xf32>
    %102 = vector.broadcast %101 : vector<1x48xf32> to vector<16x48xf32>
    %103 = arith.addf %100, %102 : vector<16x48xf32>
    %cst_104 = arith.constant 0.000000e+00 : f32
    %104 = vector.broadcast %cst_104 : f32 to vector<16x48xf32>
    %105 = arith.maximumf %103, %104 : vector<16x48xf32>
    %106 = vector.shape_cast %105 : vector<16x48xf32> to vector<8x2x48xf32>
    %107 = vector.extract_strided_slice %106 {offsets = [0, 0, 0], sizes = [8, 1, 48], strides = [1, 1, 1]} : vector<8x2x48xf32> to vector<8x1x48xf32>
    %108 = vector.shape_cast %107 : vector<8x1x48xf32> to vector<8x48xf32>
    %109 = vector.extract_strided_slice %106 {offsets = [0, 1, 0], sizes = [8, 1, 48], strides = [1, 1, 1]} : vector<8x2x48xf32> to vector<8x1x48xf32>
    %110 = vector.shape_cast %109 : vector<8x1x48xf32> to vector<8x48xf32>
    %111 = arith.maximumf %108, %110 : vector<8x48xf32>
    %112 = vector.extract_strided_slice %111 {offsets = [0, 0], sizes = [8, 42], strides = [1, 1]} : vector<8x48xf32> to vector<8x42xf32>
    %113 = vector.extract_strided_slice %111 {offsets = [0, 6], sizes = [8, 42], strides = [1, 1]} : vector<8x48xf32> to vector<8x42xf32>
    %114 = arith.maximumf %112, %113 : vector<8x42xf32>
    %115 = vector.extract_strided_slice %114 {offsets = [0, 0], sizes = [8, 6], strides = [1, 1]} : vector<8x42xf32> to vector<8x6xf32>
    %116 = vector.extract_strided_slice %114 {offsets = [0, 12], sizes = [8, 6], strides = [1, 1]} : vector<8x42xf32> to vector<8x6xf32>
    %117 = vector.extract_strided_slice %114 {offsets = [0, 24], sizes = [8, 6], strides = [1, 1]} : vector<8x42xf32> to vector<8x6xf32>
    %118 = vector.extract_strided_slice %114 {offsets = [0, 36], sizes = [8, 6], strides = [1, 1]} : vector<8x42xf32> to vector<8x6xf32>
    %119 = tpu.concatenate %115, %116, %117, %118 in 1 : vector<8x6xf32>, vector<8x6xf32>, vector<8x6xf32>, vector<8x6xf32> -> vector<8x24xf32>
    %120 = vector.shape_cast %119 : vector<8x24xf32> to vector<2x4x24xf32>
    %121 = vector.extract_strided_slice %120 {offsets = [0, 0, 0], sizes = [2, 1, 24], strides = [1, 1, 1]} : vector<2x4x24xf32> to vector<2x1x24xf32>
    %122 = vector.shape_cast %121 : vector<2x1x24xf32> to vector<2x24xf32>
    %123 = vector.extract_strided_slice %120 {offsets = [0, 1, 0], sizes = [2, 1, 24], strides = [1, 1, 1]} : vector<2x4x24xf32> to vector<2x1x24xf32>
    %124 = vector.shape_cast %123 : vector<2x1x24xf32> to vector<2x24xf32>
    %125 = vector.extract_strided_slice %120 {offsets = [0, 2, 0], sizes = [2, 1, 24], strides = [1, 1, 1]} : vector<2x4x24xf32> to vector<2x1x24xf32>
    %126 = vector.shape_cast %125 : vector<2x1x24xf32> to vector<2x24xf32>
    %127 = vector.extract_strided_slice %120 {offsets = [0, 3, 0], sizes = [2, 1, 24], strides = [1, 1, 1]} : vector<2x4x24xf32> to vector<2x1x24xf32>
    %128 = vector.shape_cast %127 : vector<2x1x24xf32> to vector<2x24xf32>
    %129 = tpu.concatenate %122, %124, %126, %128 in 1 : vector<2x24xf32>, vector<2x24xf32>, vector<2x24xf32>, vector<2x24xf32> -> vector<2x96xf32>
    %c0_105 = arith.constant 0 : index
    %c0_106 = arith.constant 0 : index
    %130 = vector.load %arg6[%c0_105, %c0_106] : memref<96x8xf32, #tpu.memory_space<vmem>>, vector<96x8xf32>
    %cst_107 = arith.constant dense<0.000000e+00> : vector<2x8xf32>
    %131 = tpu.matmul %129, %130, %cst_107 {dimension_numbers = #tpu.dot_dimension_numbers<[1], [0], [0], [1], [0, 0, 1, 1], [], []>} : vector<2x96xf32>, vector<96x8xf32>, vector<2x8xf32> -> vector<2x8xf32>
    %c0_108 = arith.constant 0 : index
    %c0_109 = arith.constant 0 : index
    %132 = vector.load %arg7[%c0_108, %c0_109] : memref<1x8xf32, #tpu.memory_space<vmem>>, vector<1x8xf32>
    %133 = vector.broadcast %132 : vector<1x8xf32> to vector<2x8xf32>
    %134 = arith.addf %131, %133 : vector<2x8xf32>
    %135 = vector.shape_cast %134 : vector<2x8xf32> to vector<2x1x8xf32>
    %c0_110 = arith.constant 0 : index
    %c0_111 = arith.constant 0 : index
    %c0_112 = arith.constant 0 : index
    %136 = vector.load %arg8[%c0_110, %c0_111, %c0_112] : memref<2x1x8xf32, #tpu.memory_space<vmem>>, vector<2x1x8xf32>
    tpu.vector_store %arg8[%c0_110, %c0_111, %c0_112], %135 {strides = array<i32>} : memref<2x1x8xf32, #tpu.memory_space<vmem>>, vector<2x1x8xf32>,
    return
  }
  func.func @transform_0(%arg0: i32) -> (i32, i32, i32) {
    %c0_i32 = arith.constant 0 : i32
    %c0_i32_0 = arith.constant 0 : i32
    %c0_i32_1 = arith.constant 0 : i32
    return %arg0, %c0_i32, %c0_i32_0 : i32, i32, i32
  }
  func.func @transform_1(%arg0: i32) -> (i32, i32, i32) {
    %c0_i32 = arith.constant 0 : i32
    %c0_i32_0 = arith.constant 0 : i32
    %c0_i32_1 = arith.constant 0 : i32
    %c0_i32_2 = arith.constant 0 : i32
    return %c0_i32, %c0_i32_0, %c0_i32_1 : i32, i32, i32
  }
  func.func @transform_2(%arg0: i32) -> (i32, i32) {
    %c0_i32 = arith.constant 0 : i32
    %c0_i32_0 = arith.constant 0 : i32
    %c0_i32_1 = arith.constant 0 : i32
    return %c0_i32, %c0_i32_0 : i32, i32
  }
  func.func @transform_3(%arg0: i32) -> (i32, i32, i32) {
    %c0_i32 = arith.constant 0 : i32
    %c0_i32_0 = arith.constant 0 : i32
    %c0_i32_1 = arith.constant 0 : i32
    %c0_i32_2 = arith.constant 0 : i32
    return %c0_i32, %c0_i32_0, %c0_i32_1 : i32, i32, i32
  }
  func.func @transform_4(%arg0: i32) -> (i32, i32) {
    %c0_i32 = arith.constant 0 : i32
    %c0_i32_0 = arith.constant 0 : i32
    %c0_i32_1 = arith.constant 0 : i32
    return %c0_i32, %c0_i32_0 : i32, i32
  }
  func.func @transform_5(%arg0: i32) -> (i32, i32) {
    %c0_i32 = arith.constant 0 : i32
    %c0_i32_0 = arith.constant 0 : i32
    %c0_i32_1 = arith.constant 0 : i32
    return %c0_i32, %c0_i32_0 : i32, i32
  }
  func.func @transform_6(%arg0: i32) -> (i32, i32) {
    %c0_i32 = arith.constant 0 : i32
    %c0_i32_0 = arith.constant 0 : i32
    %c0_i32_1 = arith.constant 0 : i32
    return %c0_i32, %c0_i32_0 : i32, i32
  }
  func.func @transform_7(%arg0: i32) -> (i32, i32, i32) {
    %c0_i32 = arith.constant 0 : i32
    %c0_i32_0 = arith.constant 0 : i32
    %c0_i32_1 = arith.constant 0 : i32
    return %arg0, %c0_i32, %c0_i32_0 : i32, i32, i32
  }
}

</mosaic_0001>

<bundles_post_ra>
// kernel: cn_forward.1
= control target key start
LH: loop header
LB: loop body
LE: loop exit
PB: predicated region body
PF: predicated region fallthrough
CT: control target
= control target key end

     0   :  { %vm27_vm0 = vcmask 648192   ;;  %s2661_s30 = smov 8   ;;  %vm32_vm1 = vcmask 64512   ;;  %vm40_vm2 = vcmask 654912   ;;  %vm35_vm3 = vcmask 60416   ;;  %s3974_s0 = inlined_call_operand.vmem [shape: f32[2,16,64], index: 0, kind: input, shape index: {}]   ;;  %s3975_s1 = inlined_call_operand.vmem [shape: f32[5,80,256], index: 1, kind: input, shape index: {}]   ;;  %s3976_s2 = inlined_call_operand.vmem [shape: f32[1,256], index: 2, kind: input, shape index: {}]   ;;  %s3977_s3 = inlined_call_operand.vmem [shape: f32[5,192,48], index: 3, kind: input, shape index: {}]   ;;  %s3978_s4 = inlined_call_operand.vmem [shape: f32[1,48], index: 4, kind: input, shape index: {}]   ;;  %s3979_s5 = inlined_call_operand.vmem [shape: f32[96,8], index: 5, kind: input, shape index: {}]   ;;  %s3980_s6 = inlined_call_operand.vmem [shape: f32[1,8], index: 6, kind: input, shape index: {}]   ;;  %s3981_s7 = inlined_call_operand.hbm [shape: f32[2,1,8], index: 7, kind: output, shape index: {}]  }
   0x1   :  { %v48_v0 = vld [vmem:[%s3974_s0] sm:$0xff]  ;;  %v49_v1 = vld [vmem:[%s3974_s0 + $0x8] sm:$0xff]  ;;  %v50_v2 = vld [vmem:[%s3974_s0 + $0x10] sm:$0xff]  ;;  %v2662_v8 = vmov 0.0   ;;  %vm43_vm4 = vcmask 650816  }
   0x2   :  { %56 = vrot.lane.b32.xlu0 %v48_v0, %s2661_s30  ;;  %60 = vrot.lane.b32.xlu1 %v50_v2, %s2661_s30  ;;  %v51_v3 = vld [vmem:[%s3974_s0 + $0x18] sm:$0xff]  ;;  %v2365_v6 = vld [vmem:[%s3975_s1 + $0x130] sm:$0xff]  ;;  %28 = vst.msk [vmem:[#allocation2] sm:$0x3] %vm27_vm0, %v2662_v8  ;;  %29 = vst.msk [vmem:[#allocation2 + $0x18] sm:$0x3] %vm27_vm0, %v2662_v8 }
   0x3   :  { %v2366_v4 = vld [vmem:[%s3975_s1 + $0x138] sm:$0xff]  ;;  %v95_v7 = vld [vmem:[%s3975_s1 + $0x90] sm:$0xff]  ;;  %34 = vst.msk [vmem:[#allocation2 + $0x8] sm:$0xff] %vm32_vm1, %v2662_v8  ;;  %38 = vst.msk [vmem:[#allocation2 + $0x20] sm:$0xff] %vm32_vm1, %v2662_v8  ;;  %199 = vmatprep.mubr.f32.mxu0 %v2662_v8  ;;  %300 = vmatprep.mubr.f32.mxu1 %v2662_v8 }
   0x4   :  { %147 = vmatprep.subr.mxu0 %v2366_v4  ;;  %v96_v5 = vld [vmem:[%s3975_s1 + $0x98] sm:$0xff]  ;;  %30 = vst.msk [vmem:[#allocation2 + $0x12] sm:$0x3] %vm27_vm0, %v2662_v8  ;;  %31 = vst.msk [vmem:[#allocation2 + $0x2a] sm:$0x3] %vm27_vm0, %v2662_v8  ;;  %v2364_v9 = vld [vmem:[%s3975_s1 + $0x128] sm:$0xff] }
   0x5   :  { %1270 = vst [vmem:[#allocation3] sm:$0x3] %v2662_v8  ;;  %1273 = vst [vmem:[#allocation3 + $0x20] sm:$0x3] %v2662_v8  ;;  %248 = vmatprep.subr.mxu1 %v96_v5  ;;  %148 = vmatpush1.msra.mxu0 %v2365_v6  ;;  %v94_v10 = vld [vmem:[%s3975_s1 + $0x88] sm:$0xff]  ;;  %v2363_v11 = vld [vmem:[%s3975_s1 + $0x120] sm:$0xff] }
   0x6   :  { %1275 = vst [vmem:[#allocation3 + $0x10] sm:$0xc] %v2662_v8  ;;  %1278 = vst [vmem:[#allocation3 + $0x30] sm:$0xc] %v2662_v8  ;;  %249 = vmatpush1.msra.mxu1 %v95_v7  ;;  %149 = vmatprep.subr.mxu0 %v2364_v9  ;;  %v93_v12 = vld [vmem:[%s3975_s1 + $0x80] sm:$0xff]  ;;  %v2362_v13 = vld [vmem:[%s3975_s1 + $0x118] sm:$0xff] }
   0x7   :  { %33 = vst.msk [vmem:[#allocation2] sm:$0xff] %vm32_vm1, %v2662_v8  ;;  %37 = vst.msk [vmem:[#allocation2 + $0x18] sm:$0xff] %vm32_vm1, %v2662_v8  ;;  %58 = vrot.lane.b32.xlu0 %v49_v1, %s2661_s30  ;;  %62 = vrot.lane.b32.xlu1 %v51_v3, %s2661_s30  ;;  %v92_v14 = vld [vmem:[%s3975_s1 + $0x78] sm:$0xff]  ;;  %v2361_v15 = vld [vmem:[%s3975_s1 + $0x110] sm:$0xff] }
   0x8   :  { %42 = vst.msk [vmem:[#allocation2 + $0x8] sm:$0xff] %vm40_vm2, %v2662_v8  ;;  %46 = vst.msk [vmem:[#allocation2 + $0x20] sm:$0xff] %vm40_vm2, %v2662_v8  ;;  %250 = vmatprep.subr.mxu1 %v94_v10  ;;  %150 = vmatpush1.msra.mxu0 %v2363_v11  ;;  %v91_v16 = vld [vmem:[%s3975_s1 + $0x70] sm:$0xff]  ;;  %v2360_v17 = vld [vmem:[%s3975_s1 + $0x108] sm:$0xff] }
   0x9   :  { %36 = vst.msk [vmem:[#allocation2 + $0x10] sm:$0xf] %vm35_vm3, %v2662_v8  ;;  %39 = vst.msk [vmem:[#allocation2 + $0x28] sm:$0xf] %vm35_vm3, %v2662_v8  ;;  %251 = vmatpush1.msra.mxu1 %v93_v12  ;;  %151 = vmatprep.subr.mxu0 %v2362_v13  ;;  %v90_v18 = vld [vmem:[%s3975_s1 + $0x68] sm:$0xff]  ;;  %v2359_v19 = vld [vmem:[%s3975_s1 + $0x100] sm:$0xff] }
   0xa   :  { %41 = vst.msk [vmem:[#allocation2] sm:$0xff] %vm40_vm2, %v2662_v8  ;;  %45 = vst.msk [vmem:[#allocation2 + $0x18] sm:$0xff] %vm40_vm2, %v2662_v8  ;;  %252 = vmatprep.subr.mxu1 %v92_v14  ;;  %152 = vmatpush1.msra.mxu0 %v2361_v15  ;;  %v89_v20 = vld [vmem:[%s3975_s1 + $0x60] sm:$0xff]  ;;  %v2358_v21 = vld [vmem:[%s3975_s1 + $0xf8] sm:$0xff] }
   0xb   :  { %44 = vst.msk [vmem:[#allocation2 + $0x10] sm:$0xf] %vm43_vm4, %v2662_v8  ;;  %47 = vst.msk [vmem:[#allocation2 + $0x28] sm:$0xf] %vm43_vm4, %v2662_v8  ;;  %253 = vmatpush1.msra.mxu1 %v91_v16  ;;  %153 = vmatprep.subr.mxu0 %v2360_v17  ;;  %v88_v22 = vld [vmem:[%s3975_s1 + $0x58] sm:$0xff]  ;;  %v2357_v23 = vld [vmem:[%s3975_s1 + $0xf0] sm:$0xff] }
   0xc   :  { %254 = vmatprep.subr.mxu1 %v90_v18  ;;  %154 = vmatpush1.msra.mxu0 %v2359_v19  ;;  %v87_v24 = vld [vmem:[%s3975_s1 + $0x50] sm:$0xff]  ;;  %v2356_v25 = vld [vmem:[%s3975_s1 + $0xe8] sm:$0xff]  ;;  %v2355_v27 = vld [vmem:[%s3975_s1 + $0xe0] sm:$0xff] }
   0xd   :  { %255 = vmatpush1.msra.mxu1 %v89_v20  ;;  %155 = vmatprep.subr.mxu0 %v2358_v21  ;;  %v86_v26 = vld [vmem:[%s3975_s1 + $0x48] sm:$0xff]  ;;  %v85_v28 = vld [vmem:[%s3975_s1 + $0x40] sm:$0xff]  ;;  %v2354_v29 = vld [vmem:[%s3975_s1 + $0xd8] sm:$0xff] }
   0xe   :  { %256 = vmatprep.subr.mxu1 %v88_v22  ;;  %156 = vmatpush1.msra.mxu0 %v2357_v23  ;;  %v84_v30 = vld [vmem:[%s3975_s1 + $0x38] sm:$0xff]  ;;  %v2353_v31 = vld [vmem:[%s3975_s1 + $0xd0] sm:$0xff]  ;;  %v2352_v33 = vld [vmem:[%s3975_s1 + $0xc8] sm:$0xff] }
   0xf   :  { %257 = vmatpush1.msra.mxu1 %v87_v24  ;;  %157 = vmatprep.subr.mxu0 %v2356_v25  ;;  %v83_v32 = vld [vmem:[%s3975_s1 + $0x30] sm:$0xff]  ;;  %v82_v34 = vld [vmem:[%s3975_s1 + $0x28] sm:$0xff]  ;;  %v2351_v35 = vld [vmem:[%s3975_s1 + $0xc0] sm:$0xff] }
  0x10   :  { %258 = vmatprep.subr.mxu1 %v86_v26  ;;  %158 = vmatpush1.msra.mxu0 %v2355_v27  ;;  %v81_v36 = vld [vmem:[%s3975_s1 + $0x20] sm:$0xff]  ;;  %v2350_v37 = vld [vmem:[%s3975_s1 + $0xb8] sm:$0xff]  ;;  %v2349_v39 = vld [vmem:[%s3975_s1 + $0xb0] sm:$0xff] }
  0x11   :  { %259 = vmatpush1.msra.mxu1 %v85_v28  ;;  %159 = vmatprep.subr.mxu0 %v2354_v29  ;;  %v80_v38 = vld [vmem:[%s3975_s1 + $0x18] sm:$0xff]  ;;  %v79_v40 = vld [vmem:[%s3975_s1 + $0x10] sm:$0xff]  ;;  %v2348_v41 = vld [vmem:[%s3975_s1 + $0xa8] sm:$0xff] }
  0x12   :  { %260 = vmatprep.subr.mxu1 %v84_v30  ;;  %160 = vmatpush1.msra.mxu0 %v2353_v31  ;;  %v78_v42 = vld [vmem:[%s3975_s1 + $0x8] sm:$0xff]  ;;  %v2347_v43 = vld [vmem:[%s3975_s1 + $0xa0] sm:$0xff]  ;;  %v2394_v45 = vld [vmem:[%s3975_s1 + $0x1d8] sm:$0xff] }
  0x13   :  { %261 = vmatpush1.msra.mxu1 %v83_v32  ;;  %161 = vmatprep.subr.mxu0 %v2352_v33  ;;  %v77_v44 = vld [vmem:[%s3975_s1] sm:$0xff]  ;;  %v2418_v46 = vld [vmem:[%s3975_s1 + $0x278] sm:$0xff] }
  0x14   :  { %262 = vmatprep.subr.mxu1 %v82_v34  ;;  %162 = vmatpush1.msra.mxu0 %v2351_v35 }
  0x15   :  { %263 = vmatpush1.msra.mxu1 %v81_v36  ;;  %163 = vmatprep.subr.mxu0 %v2350_v37 }
  0x16   :  { %264 = vmatprep.subr.mxu1 %v80_v38  ;;  %164 = vmatpush1.msra.mxu0 %v2349_v39 }
  0x17   :  { %265 = vmatpush1.msra.mxu1 %v79_v40  ;;  %165 = vmatprep.subr.mxu0 %v2348_v41 }
  0x18   :  { %266 = vmatprep.subr.mxu1 %v78_v42  ;;  %166 = vmatpush1.msra.mxu0 %v2347_v43 }
  0x19   :  { %267 = vmatpush1.msra.mxu1 %v77_v44  ;;  %374 = vmatprep.subr.mxu0 %v2394_v45 }
  0x1a   :  { %508 = vmatprep.subr.mxu1 %v2418_v46 }
  0x1b   :  { %12 = vsyncpa [#allocation5], 0  ;;  %vm68_vm5 = vcmask 588864   ;;  %vm122_vm6 = vcmask 654336   ;;  %v2393_v51 = vld [vmem:[%s3975_s1 + $0x1d0] sm:$0xff]  ;;  %v2392_v53 = vld [vmem:[%s3975_s1 + $0x1c8] sm:$0xff] }
  0x1c   :  { %v2417_v52 = vld [vmem:[%s3975_s1 + $0x270] sm:$0xff]  ;;  %v2416_v56 = vld [vmem:[%s3975_s1 + $0x268] sm:$0xff]  ;;  %v2391_v57 = vld [vmem:[%s3975_s1 + $0x1c0] sm:$0xff]  ;;  %vm979_vm7 = vcmask 916480   ;;  %vm1108_vm8 = vcmask 1041409   ;;  %vm1110_vm9 = vcmask 1042434  }
  0x1d   :  { %v2415_v58 = vld [vmem:[%s3975_s1 + $0x260] sm:$0xff]  ;;  %v2390_v59 = vld [vmem:[%s3975_s1 + $0x1b8] sm:$0xff]  ;;  %v2389_v63 = vld [vmem:[%s3975_s1 + $0x1b0] sm:$0xff]  ;;  %vm1112_vm10 = vcmask 1043459   ;;  %vm1254_vm11 = vcmask 261120   ;;  %vm1114_vm12 = vcmask 1044484  }
  0x1e   :  { %v2414_v60 = vld [vmem:[%s3975_s1 + $0x258] sm:$0xff]  ;;  %v2413_v0 = vld [vmem:[%s3975_s1 + $0x250] sm:$0xff]  ;;  %v2388_v1 = vld [vmem:[%s3975_s1 + $0x1a8] sm:$0xff]  ;;  %1280 = vst.msk [vmem:[#allocation3] sm:$0xff] %vm1254_vm11, %v2662_v8  ;;  %vm1116_vm13 = vcmask 1045509   ;;  %vm1118_vm14 = vcmask 1046534  }
  0x1f   :  { %v2412_v2 = vld [vmem:[%s3975_s1 + $0x248] sm:$0xff]  ;;  %v2387_v3 = vld [vmem:[%s3975_s1 + $0x1a0] sm:$0xff]  ;;  %v2386_v5 = vld [vmem:[%s3975_s1 + $0x198] sm:$0xff]  ;;  %1283 = vst.msk [vmem:[#allocation3 + $0x20] sm:$0xff] %vm1254_vm11, %v2662_v8  ;;  %vm1120_vm15 = vcmask 1047559   ;;  %s2665_s18 = smov 96  }
  0x20   :  { %v2411_v4 = vld [vmem:[%s3975_s1 + $0x240] sm:$0xff]  ;;  %v2410_v6 = vld [vmem:[%s3975_s1 + $0x238] sm:$0xff]  ;;  %v2385_v10 = vld [vmem:[%s3975_s1 + $0x190] sm:$0xff]  ;;  %s2666_s19 = smov 64   ;;  %s2667_s20 = smov 80   ;;  %vm1271_vm0 = vcmask 517120  }
  0x21   :  { %v2409_v11 = vld [vmem:[%s3975_s1 + $0x230] sm:$0xff]  ;;  %v2384_v12 = vld [vmem:[%s3975_s1 + $0x188] sm:$0xff]  ;;  %v2383_v14 = vld [vmem:[%s3975_s1 + $0x180] sm:$0xff]  ;;  %s2668_s21 = smov 32   ;;  %s2669_s22 = smov 48   ;;  %vm1276_vm1 = vcmask 519170  }
  0x22   :  { %v2408_v13 = vld [vmem:[%s3975_s1 + $0x228] sm:$0xff]  ;;  %v2407_v15 = vld [vmem:[%s3975_s1 + $0x220] sm:$0xff]  ;;  %v2382_v16 = vld [vmem:[%s3975_s1 + $0x178] sm:$0xff]  ;;  %s2670_s23 = smov 16   ;;  %vm1281_vm2 = vcmask 257024   ;;  %vm1285_vm3 = vcmask 523520  }
  0x23   :  { %v2406_v17 = vld [vmem:[%s3975_s1 + $0x218] sm:$0xff]  ;;  %v2381_v20 = vld [vmem:[%s3975_s1 + $0x170] sm:$0xff]  ;;  %v2380_v22 = vld [vmem:[%s3975_s1 + $0x168] sm:$0xff]  ;;  %1272 = vst.msk [vmem:[#allocation3 + $0x8] sm:$0x3] %vm1271_vm0, %v2662_v8  ;;  %vm1287_vm4 = vcmask 519424  }
  0x24   :  { %v2405_v21 = vld [vmem:[%s3975_s1 + $0x210] sm:$0xff]  ;;  %v2404_v23 = vld [vmem:[%s3975_s1 + $0x208] sm:$0xff]  ;;  %v2379_v24 = vld [vmem:[%s3975_s1 + $0x160] sm:$0xff]  ;;  %1277 = vst.msk [vmem:[#allocation3 + $0x18] sm:$0xc] %vm1276_vm1, %v2662_v8  ;;  %s2672_s29 = smov 116  }
  0x25   :  { %v2403_v25 = vld [vmem:[%s3975_s1 + $0x200] sm:$0xff]  ;;  %v2378_v26 = vld [vmem:[%s3975_s1 + $0x158] sm:$0xff]  ;;  %v2377_v28 = vld [vmem:[%s3975_s1 + $0x150] sm:$0xff]  ;;  %1282 = vst.msk [vmem:[#allocation3 + $0x10] sm:$0xf] %vm1281_vm2, %v2662_v8  ;;  %s2673_s30 = smov 110  }
  0x26   :  { %v2402_v27 = vld [vmem:[%s3975_s1 + $0x1f8] sm:$0xff]  ;;  %v2401_v29 = vld [vmem:[%s3975_s1 + $0x1f0] sm:$0xff]  ;;  %v2376_v30 = vld [vmem:[%s3975_s1 + $0x148] sm:$0xff]  ;;  %1274 = vst.msk [vmem:[#allocation3 + $0x28] sm:$0x3] %vm1271_vm0, %v2662_v8  ;;  %vm1257_vm0 = vcmask 392192  }
  0x27   :  { %v2400_v31 = vld [vmem:[%s3975_s1 + $0x1e8] sm:$0xff]  ;;  %v2375_v32 = vld [vmem:[%s3975_s1 + $0x140] sm:$0xff]  ;;  %v2442_v34 = vld [vmem:[%s3975_s1 + $0x318] sm:$0xff]  ;;  %1279 = vst.msk [vmem:[#allocation3 + $0x38] sm:$0xc] %vm1276_vm1, %v2662_v8  ;;  %vm1260_vm1 = vcmask 523264  }
  0x28   :  { %v2399_v33 = vld [vmem:[%s3975_s1 + $0x1e0] sm:$0xff]  ;;  %v2441_v37 = vld [vmem:[%s3975_s1 + $0x310] sm:$0xff]  ;;  %v2440_v38 = vld [vmem:[%s3975_s1 + $0x308] sm:$0xff]  ;;  %1284 = vst.msk [vmem:[#allocation3 + $0x30] sm:$0xf] %vm1281_vm2, %v2662_v8  ;;  %vm1265_vm2 = vcmask 785408  }
  0x29   :  { %v2439_v39 = vld [vmem:[%s3975_s1 + $0x300] sm:$0xff]  ;;  %v2438_v40 = vld [vmem:[%s3975_s1 + $0x2f8] sm:$0xff]  ;;  %v2437_v42 = vld [vmem:[%s3975_s1 + $0x2f0] sm:$0xff]  ;;  %1286 = vst.msk [vmem:[#allocation3 + $0x8] sm:$0xff] %vm1285_vm3, %v2662_v8  ;;  %s2678_s8 = smov [#allocation4]  }
  0x2a   :  { %v2436_v44 = vld [vmem:[%s3975_s1 + $0x2e8] sm:$0xff]  ;;  %v2435_v45 = vld [vmem:[%s3975_s1 + $0x2e0] sm:$0xff]  ;;  %v2434_v46 = vld [vmem:[%s3975_s1 + $0x2d8] sm:$0xff]  ;;  %1288 = vst.msk [vmem:[#allocation3 + $0x18] sm:$0xf] %vm1287_vm4, %v2662_v8  ;;  %s2336_s9 = sshll.u32 %s2678_s8, 4  ;;  %s2337_s9 = int_to_ptr.vmem [resolvable:$true] %s2336_s9 }
  0x2b   :  { %1289 = vst.msk [vmem:[#allocation3 + $0x28] sm:$0xff] %vm1285_vm3, %v2662_v8  ;;  %vm1301_vm3 = vcmask 1047810   ;;  %s2639_s10 = scalar_lea.vmem %s2337_s9, 32  ;;  %p2644_p1 = scmp.lt.s32.totalorder %s2337_s9, %s2337_s9 }
  0x2c   :  { %1290 = vst.msk [vmem:[#allocation3 + $0x38] sm:$0xf] %vm1287_vm4, %v2662_v8  ;;  %vm1303_vm4 = vcmask 261122   ;;  %p2640_p0 = scmp.ne.s32.totalorder %s2337_s9, %s2639_s10  ;;  %p2645_p2 = scmp.lt.s32.totalorder %s2639_s10, %s2639_s10 }
  0x2e   :  { %p2646_p3 = por %p2645_p2, %p2644_p1 }
  0x30   :  { %p2647_p4 = pnand %p2646_p3, %p2640_p0 }
  0x74   :  { %v57_v47 = vpop.permute.xlu0 %56  ;;  %v61_v48 = vpop.permute.xlu1 %60 }
  0x75   :  { %69 = vst.msk [vmem:[#allocation2 + $0x2] sm:$0xff] %vm68_vm5, %v57_v47  ;;  %71 = vst.msk [vmem:[#allocation2 + $0x1a] sm:$0xff] %vm68_vm5, %v61_v48  ;;  %v2433_v48 = vld [vmem:[%s3975_s1 + $0x2d0] sm:$0xff] }
  0x79   :  { %v59_v49 = vpop.permute.xlu0 %58  ;;  %v63_v50 = vpop.permute.xlu1 %62 }
  0x7a   :  { %70 = vst.msk [vmem:[#allocation2 + $0xa] sm:$0xff] %vm68_vm5, %v59_v49  ;;  %72 = vst.msk [vmem:[#allocation2 + $0x22] sm:$0xff] %vm68_vm5, %v63_v50  ;;  %v2432_v50 = vld [vmem:[%s3975_s1 + $0x2c8] sm:$0xff]  ;;  %vm1251_vm5 = vcmask 130048  }
  0x7c   :  { %v97_v54 = vld [vmem:[#allocation2 + $0x1] sm:$0xff]  ;;  %v99_v7 = vld [vmem:[#allocation2 + $0x19] sm:$0xff] }
  0x7d   :  { %v73_v55 = vld [vmem:[#allocation2] sm:$0xff]  ;;  %2367 = vmatmul.mubr.msk.f32.vlgmr.msra.gmra.mxu0 %vm122_vm6, %v97_v54  ;;  %v75_v9 = vld [vmem:[#allocation2 + $0x18] sm:$0xff]  ;;  %v2429_v54 = vld [vmem:[%s3975_s1 + $0x2b0] sm:$0xff] }
  0x7e   :  { %2371 = vmatmul.mubr.msk.f32.vlgmr.msra.gmra.mxu1 %vm122_vm6, %v73_v55  ;;  %375 = vmatpush1.msra.mxu0 %v2393_v51  ;;  %v325_v35 = vld [vmem:[#allocation2 + $0x2] sm:$0xff]  ;;  %v327_v49 = vld [vmem:[#allocation2 + $0x1a] sm:$0xff] }
  0x7f   :  { %509 = vmatpush1.msra.mxu1 %v2417_v52  ;;  %376 = vmatprep.subr.mxu0 %v2392_v53  ;;  %v2431_v51 = vld [vmem:[%s3975_s1 + $0x2c0] sm:$0xff]  ;;  %v2430_v52 = vld [vmem:[%s3975_s1 + $0x2b8] sm:$0xff] }
  0x80   :  { %510 = vmatprep.subr.mxu1 %v2416_v56  ;;  %377 = vmatpush1.msra.mxu0 %v2391_v57  ;;  %v2428_v56 = vld [vmem:[%s3975_s1 + $0x2a8] sm:$0xff]  ;;  %v2427_v57 = vld [vmem:[%s3975_s1 + $0x2a0] sm:$0xff] }
  0x81   :  { %511 = vmatpush1.msra.mxu1 %v2415_v58  ;;  %v98_v61 = vld [vmem:[#allocation2 + $0x9] sm:$0xff]  ;;  %205 = vmatprep.mubr.f32.mxu0 %v2662_v8  ;;  %v100_v18 = vld [vmem:[#allocation2 + $0x21] sm:$0xff]  ;;  %v2426_v58 = vld [vmem:[%s3975_s1 + $0x298] sm:$0xff] }
  0x82   :  { %v74_v62 = vld [vmem:[#allocation2 + $0x8] sm:$0xff]  ;;  %306 = vmatprep.mubr.f32.mxu1 %v2662_v8  ;;  %378 = vmatprep.subr.mxu0 %v2390_v59  ;;  %v76_v19 = vld [vmem:[#allocation2 + $0x20] sm:$0xff]  ;;  %v2425_v59 = vld [vmem:[%s3975_s1 + $0x290] sm:$0xff] }
  0x83   :  { %512 = vmatprep.subr.mxu1 %v2414_v60  ;;  %2368 = vmatmul.mubr.msk.f32.gmra.mxu0 %vm122_vm6, %v98_v61  ;;  %v459_v36 = vld [vmem:[#allocation2 + $0x3] sm:$0xff]  ;;  %v460_v41 = vld [vmem:[#allocation2 + $0xb] sm:$0xff]  ;;  %v461_v47 = vld [vmem:[#allocation2 + $0x1b] sm:$0xff] }
  0x84   :  { %2372 = vmatmul.mubr.msk.f32.gmra.mxu1 %vm122_vm6, %v74_v62  ;;  %379 = vmatpush1.msra.mxu0 %v2389_v63  ;;  %v326_v43 = vld [vmem:[#allocation2 + $0xa] sm:$0xff]  ;;  %v328_v55 = vld [vmem:[#allocation2 + $0x22] sm:$0xff] }
  0x85   :  { %513 = vmatpush1.msra.mxu1 %v2413_v0  ;;  %380 = vmatprep.subr.mxu0 %v2388_v1  ;;  %v462_v53 = vld [vmem:[#allocation2 + $0x23] sm:$0xff]  ;;  %v594_v63 = vld [vmem:[#allocation2 + $0xc] sm:$0xff] }
  0x86   :  { %514 = vmatprep.subr.mxu1 %v2412_v2  ;;  %381 = vmatpush1.msra.mxu0 %v2387_v3  ;;  %v2424_v60 = vld [vmem:[%s3975_s1 + $0x288] sm:$0xff]  ;;  %v2423_v61 = vld [vmem:[%s3975_s1 + $0x280] sm:$0xff] }
  0x87   :  { %515 = vmatpush1.msra.mxu1 %v2411_v4  ;;  %211 = vmatprep.mubr.f32.mxu0 %v2662_v8  ;;  %v593_v62 = vld [vmem:[#allocation2 + $0x4] sm:$0xff]  ;;  %v595_v0 = vld [vmem:[#allocation2 + $0x1c] sm:$0xff] }
  0x88   :  { %312 = vmatprep.mubr.f32.mxu1 %v2662_v8  ;;  %382 = vmatprep.subr.mxu0 %v2386_v5  ;;  %v596_v1 = vld [vmem:[#allocation2 + $0x24] sm:$0xff] }
  0x89   :  { %516 = vmatprep.subr.mxu1 %v2410_v6  ;;  %2369 = vmatmul.mubr.msk.f32.gmra.mxu0 %vm122_vm6, %v99_v7 }
  0x8a   :  { %2373 = vmatmul.mubr.msk.f32.gmra.mxu1 %vm122_vm6, %v75_v9  ;;  %383 = vmatpush1.msra.mxu0 %v2385_v10 }
  0x8b   :  { %517 = vmatpush1.msra.mxu1 %v2409_v11  ;;  %384 = vmatprep.subr.mxu0 %v2384_v12 }
  0x8c   :  { %518 = vmatprep.subr.mxu1 %v2408_v13  ;;  %385 = vmatpush1.msra.mxu0 %v2383_v14 }
  0x8d   :  { %519 = vmatpush1.msra.mxu1 %v2407_v15  ;;  %217 = vmatprep.mubr.f32.mxu0 %v2662_v8 }
  0x8e   :  { %318 = vmatprep.mubr.f32.mxu1 %v2662_v8  ;;  %386 = vmatprep.subr.mxu0 %v2382_v16 }
  0x8f   :  { %520 = vmatprep.subr.mxu1 %v2406_v17  ;;  %2370 = vmatmul.mubr.msk.f32.gmra.mxu0 %vm122_vm6, %v100_v18 }
  0x90   :  { %2374 = vmatmul.mubr.msk.f32.gmra.mxu1 %vm122_vm6, %v76_v19  ;;  %387 = vmatpush1.msra.mxu0 %v2381_v20 }
  0x91   :  { %521 = vmatpush1.msra.mxu1 %v2405_v21  ;;  %388 = vmatprep.subr.mxu0 %v2380_v22 }
  0x92   :  { %522 = vmatprep.subr.mxu1 %v2404_v23  ;;  %389 = vmatpush1.msra.mxu0 %v2379_v24  ;;  %v729_v24 = vlaneseq }
  0x93   :  { %523 = vmatpush1.msra.mxu1 %v2403_v25  ;;  %390 = vmatprep.subr.mxu0 %v2378_v26 }
  0x94   :  { %524 = vmatprep.subr.mxu1 %v2402_v27  ;;  %391 = vmatpush1.msra.mxu0 %v2377_v28  ;;  %v3114_v28 = vshrl.u32 %v729_v24, 7 }
  0x95   :  { %525 = vmatpush1.msra.mxu1 %v2401_v29  ;;  %392 = vmatprep.subr.mxu0 %v2376_v30 }
  0x96   :  { %526 = vmatprep.subr.mxu1 %v2400_v31  ;;  %393 = vmatpush1.msra.mxu0 %v2375_v32 }
  0x97   :  { %426 = vmatprep.mubr.f32.mxu0 %v2662_v8  ;;  %527 = vmatpush1.msra.mxu1 %v2399_v33 }
  0x98   :  { %560 = vmatprep.mubr.f32.mxu1 %v2662_v8  ;;  %2395 = vmatmul.mubr.msk.f32.vlgmr.msra.gmra.mxu0 %vm122_vm6, %v325_v35  ;;  %v727_v35 = vld [vmem:[%s3976_s2] sm:$0x3]  ;;  %s2664_s2 = smov 112  }
  0x99   :  { %2419 = vmatmul.mubr.msk.f32.vlgmr.msra.gmra.mxu1 %vm122_vm6, %v459_v36  ;;  %642 = vmatprep.subr.mxu0 %v2442_v34  ;;  %v3117_v34 = vsub.s32 0, %v3114_v28 }
  0x9a   :  { %432 = vmatprep.mubr.f32.mxu0 %v2662_v8  ;;  %643 = vmatpush1.msra.mxu0 %v2441_v37 }
  0x9b   :  { %566 = vmatprep.mubr.f32.mxu1 %v2662_v8  ;;  %644 = vmatprep.subr.mxu0 %v2440_v38 }
  0x9c   :  { %1401 = vmatprep.subr.mxu1 %v2662_v8  ;;  %645 = vmatpush1.msra.mxu0 %v2439_v39  ;;  %v3123_v39 = vsub.s32 1, %v3114_v28 }
  0x9d   :  { %2420 = vmatmul.mubr.msk.f32.gmra.mxu1 %vm122_vm6, %v460_v41  ;;  %2396 = vmatmul.mubr.msk.f32.gmra.mxu0 %vm122_vm6, %v326_v43  ;;  %v2663_v41 = vmov 1983009808  }
  0x9e   :  { %646 = vmatprep.subr.mxu0 %v2438_v40  ;;  %438 = vmatprep.mubr.f32.mxu0 %v2662_v8 }
  0x9f   :  { %647 = vmatpush1.msra.mxu0 %v2437_v42  ;;  %572 = vmatprep.mubr.f32.mxu1 %v2662_v8  ;;  %v766_v42 = vunpack.c.l.s4 %v2663_v41 }
  0xa0   :  { %648 = vmatprep.subr.mxu0 %v2436_v44 }
  0xa1   :  { %649 = vmatpush1.msra.mxu0 %v2435_v45  ;;  %2421 = vmatmul.mubr.msk.f32.gmra.mxu1 %vm122_vm6, %v461_v47 }
  0xa2   :  { %2397 = vmatmul.mubr.msk.f32.gmra.mxu0 %vm122_vm6, %v327_v49  ;;  %650 = vmatprep.subr.mxu0 %v2434_v46  ;;  %v3126_v46 = vrot.slane %v727_v35, %v3117_v34 }
  0xa3   :  { %651 = vmatpush1.msra.mxu0 %v2433_v48  ;;  %444 = vmatprep.mubr.f32.mxu0 %v2662_v8 }
  0xa4   :  { %652 = vmatprep.subr.mxu0 %v2432_v50  ;;  %578 = vmatprep.mubr.f32.mxu1 %v2662_v8 }
  0xa5   :  { %653 = vmatpush1.msra.mxu0 %v2431_v51  ;;  %2422 = vmatmul.mubr.msk.f32.gmra.mxu1 %vm122_vm6, %v462_v53 }
  0xa6   :  { %2398 = vmatmul.mubr.msk.f32.gmra.mxu0 %vm122_vm6, %v328_v55  ;;  %654 = vmatprep.subr.mxu0 %v2430_v52  ;;  %v736_v52 = vrot.slane %v727_v35, %v3123_v39 }
  0xa7   :  { %655 = vmatpush1.msra.mxu0 %v2429_v54  ;;  %694 = vmatprep.mubr.f32.mxu0 %v2662_v8 }
  0xa8   :  { %656 = vmatprep.subr.mxu0 %v2428_v56  ;;  %v767_v56 = vunpack.c.0.s8 %v766_v42 }
  0xa9   :  { %657 = vmatpush1.msra.mxu0 %v2427_v57 }
  0xaa   :  { %658 = vmatprep.subr.mxu0 %v2426_v58 }
  0xab   :  { %659 = vmatpush1.msra.mxu0 %v2425_v59 }
  0xac   :  { %660 = vmatprep.subr.mxu0 %v2424_v60 }
  0xad   :  { %661 = vmatpush1.msra.mxu0 %v2423_v61 }
  0xae   :  { %2443 = vmatmul.mubr.msk.f32.vlgmr.msra.gmra.mxu0 %vm122_vm6, %v593_v62  ;;  %1482 = vmatprep.subr.mxu0 %v2662_v8 }
  0xaf   :  { %700 = vmatprep.mubr.f32.mxu0 %v2662_v8 }
  0xb2   :  { %2444 = vmatmul.mubr.msk.f32.gmra.mxu0 %vm122_vm6, %v594_v63 }
  0xb3   :  { %706 = vmatprep.mubr.f32.mxu0 %v2662_v8 }
  0xb6   :  { %2445 = vmatmul.mubr.msk.f32.gmra.mxu0 %vm122_vm6, %v595_v0 }
  0xb7   :  { %712 = vmatprep.mubr.f32.mxu0 %v2662_v8 }
  0xba   :  { %2446 = vmatmul.mubr.msk.f32.gmra.mxu0 %vm122_vm6, %v596_v1 }
 0x13d   :  { %v201_v2 = vpop.f32.mrf.mxu0 }
 0x13e   :  { %v302_v4 = vpop.f32.mrf.mxu1 }
 0x13f   :  { %v203_v3 = vpop.f32.mrf.mxu0  ;;  %v303_v29 = vadd.f32 %v302_v4, %v201_v2  ;;  %v3131_v4 = vsub.s32 %v767_v56, %v3114_v28 }
 0x140   :  { %v304_v6 = vpop.f32.mrf.mxu1 }
 0x141   :  { %v305_v32 = vadd.f32 %v304_v6, %v203_v3 }
 0x143   :  { %v207_v5 = vpop.f32.mrf.mxu0 }
 0x144   :  { %v308_v9 = vpop.f32.mrf.mxu1 }
 0x145   :  { %v209_v7 = vpop.f32.mrf.mxu0  ;;  %v309_v36 = vadd.f32 %v308_v9, %v207_v5 }
 0x146   :  { %v310_v11 = vpop.f32.mrf.mxu1 }
 0x147   :  { %v311_v43 = vadd.f32 %v310_v11, %v209_v7 }
 0x149   :  { %v213_v10 = vpop.f32.mrf.mxu0 }
 0x14a   :  { %v314_v13 = vpop.f32.mrf.mxu1 }
 0x14b   :  { %v215_v12 = vpop.f32.mrf.mxu0  ;;  %v315_v53 = vadd.f32 %v314_v13, %v213_v10 }
 0x14c   :  { %v316_v15 = vpop.f32.mrf.mxu1 }
 0x14d   :  { %v317_v54 = vadd.f32 %v316_v15, %v215_v12 }
 0x14f   :  { %v219_v14 = vpop.f32.mrf.mxu0 }
 0x150   :  { %v320_v17 = vpop.f32.mrf.mxu1 }
 0x151   :  { %v221_v16 = vpop.f32.mrf.mxu0  ;;  %v321_v3 = vadd.f32 %v320_v17, %v219_v14 }
 0x152   :  { %v322_v20 = vpop.f32.mrf.mxu1 }
 0x153   :  { %v323_v11 = vadd.f32 %v322_v20, %v221_v16 }
 0x158   :  { %v428_v18 = vpop.f32.mrf.mxu0 }
 0x159   :  { %v562_v22 = vpop.f32.mrf.mxu1  ;;  %v451_v33 = vadd.f32 %v428_v18, %v303_v29 }
 0x15a   :  { %v430_v19 = vpop.f32.mrf.mxu0 }
 0x15b   :  { %v564_v26 = vpop.f32.mrf.mxu1  ;;  %v452_v37 = vadd.f32 %v430_v19, %v305_v32  ;;  %v585_v44 = vadd.f32 %v562_v22, %v451_v33 }
 0x15d   :  { %v434_v21 = vpop.f32.mrf.mxu0  ;;  %v568_v30 = vpop.f32.mrf.mxu1  ;;  %v586_v48 = vadd.f32 %v564_v26, %v452_v37 }
 0x15e   :  { %v453_v45 = vadd.f32 %v434_v21, %v309_v36 }
 0x15f   :  { %v436_v23 = vpop.f32.mrf.mxu0  ;;  %v570_v38 = vpop.f32.mrf.mxu1 }
 0x160   :  { %v454_v49 = vadd.f32 %v436_v23, %v311_v43  ;;  %v587_v57 = vadd.f32 %v568_v30, %v453_v45 }
 0x161   :  { %v574_v50 = vpop.f32.mrf.mxu1 }
 0x162   :  { %v440_v25 = vpop.f32.mrf.mxu0  ;;  %v588_v63 = vadd.f32 %v570_v38, %v454_v49 }
 0x163   :  { %v455_v60 = vadd.f32 %v440_v25, %v315_v53  ;;  %v576_v0 = vpop.f32.mrf.mxu1 }
 0x164   :  { %v442_v27 = vpop.f32.mrf.mxu0 }
 0x165   :  { %v456_v61 = vadd.f32 %v442_v27, %v317_v54  ;;  %v589_v12 = vadd.f32 %v574_v50, %v455_v60  ;;  %v580_v19 = vpop.f32.mrf.mxu1 }
 0x166   :  { %v446_v31 = vpop.f32.mrf.mxu0 }
 0x167   :  { %v590_v13 = vadd.f32 %v576_v0, %v456_v61  ;;  %v457_v18 = vadd.f32 %v446_v31, %v321_v3  ;;  %v582_v33 = vpop.f32.mrf.mxu1 }
 0x168   :  { %v448_v40 = vpop.f32.mrf.mxu0 }
 0x169   :  { %v458_v24 = vadd.f32 %v448_v40, %v323_v11  ;;  %v591_v32 = vadd.f32 %v580_v19, %v457_v18 }
 0x16b   :  { %v592_v36 = vadd.f32 %v582_v33, %v458_v24 }
 0x16e   :  { %v696_v47 = vpop.f32.mrf.mxu0 }
 0x16f   :  { %v719_v51 = vadd.f32 %v696_v47, %v585_v44 }
 0x170   :  { %v698_v55 = vpop.f32.mrf.mxu0 }
 0x171   :  { %v739_v58 = vadd.f32 %v3126_v46, %v719_v51  ;;  %v720_v59 = vadd.f32 %v698_v55, %v586_v48 }
 0x172   :  { %v702_v62 = vpop.f32.mrf.mxu0 }
 0x173   :  { %v740_v1 = vadd.f32 %v736_v52, %v720_v59  ;;  %v721_v2 = vadd.f32 %v702_v62, %v587_v57  ;;  %v747_v6 = vmax.f32 %v739_v58, 0.0 }
 0x174   :  { %v704_v5 = vpop.f32.mrf.mxu0 }
 0x175   :  { %v748_v7 = vmax.f32 %v740_v1, 0.0  ;;  %v741_v9 = vadd.f32 %v3126_v46, %v721_v2  ;;  %v722_v10 = vadd.f32 %v704_v5, %v588_v63 }
 0x176   :  { %v708_v15 = vpop.f32.mrf.mxu0 }
 0x177   :  { %v763_v21 = vcombine.low %v747_v6, %v748_v7  ;;  %v764_v22 = vcombine.high %v747_v6, %v748_v7  ;;  %v742_v23 = vadd.f32 %v736_v52, %v722_v10  ;;  %v723_v14 = vadd.f32 %v708_v15, %v589_v12 }
 0x178   :  { %v710_v17 = vpop.f32.mrf.mxu0  ;;  %v749_v26 = vmax.f32 %v741_v9, 0.0 }
 0x179   :  { %v771_v25 = vrot.slane %v763_v21, %v3131_v4  ;;  %v750_v27 = vmax.f32 %v742_v23, 0.0  ;;  %v724_v29 = vadd.f32 %v710_v17, %v590_v13  ;;  %v778_v30 = vrot.slane %v764_v22, %v3131_v4 }
 0x17a   :  { %v743_v16 = vadd.f32 %v3126_v46, %v723_v14  ;;  %v714_v20 = vpop.f32.mrf.mxu0 }
 0x17b   :  { %v781_v31 = vcombine.low %v749_v26, %v750_v27  ;;  %v744_v35 = vadd.f32 %v736_v52, %v724_v29  ;;  %v782_v37 = vcombine.high %v749_v26, %v750_v27  ;;  %v2447_v40 = vrot.slane %v771_v25, 9 }
 0x17c   :  { %v716_v38 = vpop.f32.mrf.mxu0  ;;  %v779_v41 = vcombine.high %v771_v25, %v771_v25  ;;  %v751_v43 = vmax.f32 %v743_v16, 0.0  ;;  %v725_v45 = vadd.f32 %v714_v20, %v591_v32  ;;  %v2449_v50 = vrot.slane %v778_v30, 9 }
 0x17d   :  { %v789_v42 = vrot.slane %v781_v31, %v3131_v4  ;;  %v752_v44 = vmax.f32 %v744_v35, 0.0  ;;  %v726_v47 = vadd.f32 %v716_v38, %v592_v36  ;;  %v3138_v48 = vmax.f32 %v771_v25, %v2447_v40 }
 0x17e   :  { %v2448_v49 = vrot.slane %v779_v41, 9  ;;  %v780_v53 = vcombine.high %v778_v30, %v778_v30  ;;  %v796_v54 = vrot.slane %v782_v37, %v3131_v4  ;;  %v745_v59 = vadd.f32 %v3126_v46, %v725_v45 }
 0x17f   :  { %v799_v51 = vcombine.low %v751_v43, %v752_v44  ;;  %v746_v55 = vadd.f32 %v736_v52, %v726_v47  ;;  %931 = vrot.lane.b32.xlu0 %v3138_v48, %s2664_s2  ;;  %v797_v57 = vcombine.high %v789_v42, %v789_v42  ;;  %v3148_v60 = vmax.f32 %v778_v30, %v2449_v50 }
 0x180   :  { %v3143_v56 = vmax.f32 %v779_v41, %v2448_v49  ;;  %v2450_v58 = vrot.slane %v780_v53, 9  ;;  %v2451_v61 = vrot.slane %v789_v42, 9  ;;  %v800_v62 = vcombine.high %v751_v43, %v752_v44 }
 0x181   :  { %v807_v63 = vrot.slane %v799_v51, %v3131_v4  ;;  %v754_v52 = vmax.f32 %v746_v55, 0.0  ;;  %v2452_v1 = vrot.slane %v797_v57, 9  ;;  %v798_v2 = vcombine.high %v796_v54, %v796_v54 }
 0x182   :  { %933 = vrot.lane.b32.xlu1 %v3143_v56, %s2664_s2  ;;  %v3153_v0 = vmax.f32 %v780_v53, %v2450_v58  ;;  %v753_v3 = vmax.f32 %v745_v59, 0.0  ;;  %v3157_v46 = vmax.f32 %v789_v42, %v2451_v61  ;;  %v2453_v5 = vrot.slane %v796_v54, 9 }
 0x183   :  { %935 = vrot.lane.b32.xlu0 %v3148_v60, %s2664_s2  ;;  %v814_v6 = vrot.slane %v800_v62, %v3131_v4  ;;  %v3162_v9 = vmax.f32 %v797_v57, %v2452_v1  ;;  %v2454_v10 = vrot.slane %v798_v2, 9  ;;  %v815_v11 = vcombine.high %v807_v63, %v807_v63 }
 0x184   :  { %v817_v7 = vcombine.low %v753_v3, %v754_v52  ;;  %v3166_v12 = vmax.f32 %v796_v54, %v2453_v5  ;;  %v2455_v13 = vrot.slane %v807_v63, 9  ;;  %v818_v15 = vcombine.high %v753_v3, %v754_v52 }
 0x185   :  { %v3171_v19 = vmax.f32 %v798_v2, %v2454_v10  ;;  %v2456_v21 = vrot.slane %v815_v11, 9  ;;  %v816_v22 = vcombine.high %v814_v6, %v814_v6  ;;  %v2457_v24 = vrot.slane %v814_v6, 9 }
 0x186   :  { %937 = vrot.lane.b32.xlu1 %v3153_v0, %s2664_s2  ;;  %v825_v18 = vrot.slane %v817_v7, %v3131_v4  ;;  %v3175_v23 = vmax.f32 %v807_v63, %v2455_v13  ;;  %v832_v14 = vrot.slane %v818_v15, %v3131_v4  ;;  %v3210_v44 = vsub.s32 2, %v3114_v28 }
 0x187   :  { %939 = vrot.lane.b32.xlu0 %v3157_v46, %s2664_s2  ;;  %v3180_v17 = vmax.f32 %v815_v11, %v2456_v21  ;;  %v2458_v25 = vrot.slane %v816_v22, 9  ;;  %v3184_v27 = vmax.f32 %v814_v6, %v2457_v24 }
 0x188   :  { %v833_v26 = vcombine.high %v825_v18, %v825_v18  ;;  %v2459_v29 = vrot.slane %v825_v18, 9  ;;  %v834_v20 = vcombine.high %v832_v14, %v832_v14  ;;  %v2461_v33 = vrot.slane %v832_v14, 9 }
 0x189   :  { %v3188_v30 = vmax.f32 %v816_v22, %v2458_v25 }
 0x18a   :  { %941 = vrot.lane.b32.xlu1 %v3162_v9, %s2664_s2  ;;  %v2460_v16 = vrot.slane %v833_v26, 9  ;;  %v3192_v32 = vmax.f32 %v825_v18, %v2459_v29  ;;  %v2462_v35 = vrot.slane %v834_v20, 9  ;;  %v3200_v36 = vmax.f32 %v832_v14, %v2461_v33 }
 0x18b   :  { %943 = vrot.lane.b32.xlu0 %v3166_v12, %s2664_s2 }
 0x18c   :  { %v3196_v31 = vmax.f32 %v833_v26, %v2460_v16  ;;  %v3204_v37 = vmax.f32 %v834_v20, %v2462_v35 }
 0x18e   :  { %945 = vrot.lane.b32.xlu1 %v3171_v19, %s2664_s2 }
 0x18f   :  { %947 = vrot.lane.b32.xlu0 %v3175_v23, %s2664_s2 }
 0x192   :  { %949 = vrot.lane.b32.xlu1 %v3180_v17, %s2664_s2 }
 0x193   :  { %951 = vrot.lane.b32.xlu0 %v3184_v27, %s2664_s2 }
 0x196   :  { %953 = vrot.lane.b32.xlu1 %v3188_v30, %s2664_s2 }
 0x197   :  { %955 = vrot.lane.b32.xlu0 %v3192_v32, %s2664_s2 }
 0x19a   :  { %957 = vrot.lane.b32.xlu1 %v3196_v31, %s2664_s2 }
 0x19b   :  { %959 = vrot.lane.b32.xlu0 %v3200_v36, %s2664_s2 }
 0x19e   :  { %961 = vrot.lane.b32.xlu1 %v3204_v37, %s2664_s2 }
 0x1f1   :  { %v932_v38 = vpop.permute.xlu0 %931 }
 0x1f2   :  { %v963_v40 = vrot.slane %v932_v38, 2 }
 0x1f4   :  { %v934_v41 = vpop.permute.xlu1 %933  ;;  %v980_v42 = vsel %vm979_vm7, %v932_v38, %v963_v40 }
 0x1f5   :  { %v964_v43 = vrot.slane %v934_v41, 2  ;;  %v1012_v45 = vmax.f32 %v3138_v48, %v980_v42  ;;  %v936_v47 = vpop.permute.xlu0 %935 }
 0x1f6   :  { %v965_v50 = vrot.slane %v936_v47, 2 }
 0x1f7   :  { %v981_v49 = vsel %vm979_vm7, %v934_v41, %v964_v43  ;;  %v1047_v54 = vrot.slane %v1012_v45, %v3117_v34  ;;  %v1152_v58 = vrot.slane %v1012_v45, %v3210_v44 }
 0x1f8   :  { %v1013_v51 = vmax.f32 %v3143_v56, %v981_v49  ;;  %v938_v53 = vpop.permute.xlu1 %937  ;;  %v982_v55 = vsel %vm979_vm7, %v936_v47, %v965_v50 }
 0x1f9   :  { %v966_v57 = vrot.slane %v938_v53, 2  ;;  %v1014_v48 = vmax.f32 %v3148_v60, %v982_v55  ;;  %v940_v62 = vpop.permute.xlu0 %939 }
 0x1fa   :  { %v1051_v59 = vrot.slane %v1013_v51, %v3117_v34  ;;  %v1156_v61 = vrot.slane %v1013_v51, %v3210_v44  ;;  %v967_v63 = vrot.slane %v940_v62, 2 }
 0x1fb   :  { %v983_v56 = vsel %vm979_vm7, %v938_v53, %v966_v57  ;;  %v1055_v2 = vrot.slane %v1014_v48, %v3117_v34  ;;  %v1160_v3 = vrot.slane %v1014_v48, %v3210_v44 }
 0x1fc   :  { %v1109_v52 = vsel %vm1108_vm8, %v1051_v59, %v1047_v54  ;;  %v1213_v1 = vsel %vm1108_vm8, %v1156_v61, %v1152_v58  ;;  %v942_v5 = vpop.permute.xlu1 %941  ;;  %v1015_v6 = vmax.f32 %v3153_v0, %v983_v56  ;;  %v984_v7 = vsel %vm979_vm7, %v940_v62, %v967_v63 }
 0x1fd   :  { %v968_v60 = vrot.slane %v942_v5, 2  ;;  %v1111_v10 = vsel %vm1110_vm9, %v1055_v2, %v1109_v52  ;;  %v1214_v11 = vsel %vm1110_vm9, %v1160_v3, %v1213_v1  ;;  %v1016_v13 = vmax.f32 %v3157_v46, %v984_v7  ;;  %v944_v15 = vpop.permute.xlu0 %943 }
 0x1fe   :  { %v1059_v0 = vrot.slane %v1015_v6, %v3117_v34  ;;  %v1164_v18 = vrot.slane %v1015_v6, %v3210_v44  ;;  %v969_v22 = vrot.slane %v944_v15, 2 }
 0x1ff   :  { %v985_v21 = vsel %vm979_vm7, %v942_v5, %v968_v60  ;;  %v1063_v24 = vrot.slane %v1016_v13, %v3117_v34  ;;  %v1168_v14 = vrot.slane %v1016_v13, %v3210_v44 }
 0x200   :  { %v1017_v46 = vmax.f32 %v3162_v9, %v985_v21  ;;  %v946_v25 = vpop.permute.xlu1 %945  ;;  %v1113_v26 = vsel %vm1112_vm10, %v1059_v0, %v1111_v10  ;;  %v1215_v29 = vsel %vm1112_vm10, %v1164_v18, %v1214_v11  ;;  %v986_v16 = vsel %vm979_vm7, %v944_v15, %v969_v22 }
 0x201   :  { %v970_v20 = vrot.slane %v946_v25, 2  ;;  %v1115_v33 = vsel %vm1114_vm12, %v1063_v24, %v1113_v26  ;;  %v1216_v35 = vsel %vm1114_vm12, %v1168_v14, %v1215_v29  ;;  %v948_v41 = vpop.permute.xlu0 %947  ;;  %v1018_v9 = vmax.f32 %v3166_v12, %v986_v16 }
 0x202   :  { %v1067_v38 = vrot.slane %v1017_v46, %v3117_v34  ;;  %v1172_v40 = vrot.slane %v1017_v46, %v3210_v44  ;;  %v971_v43 = vrot.slane %v948_v41, 2 }
 0x203   :  { %v987_v42 = vsel %vm979_vm7, %v946_v25, %v970_v20  ;;  %v1071_v51 = vrot.slane %v1018_v9, %v3117_v34  ;;  %v1176_v53 = vrot.slane %v1018_v9, %v3210_v44 }
 0x204   :  { %v1019_v45 = vmax.f32 %v3171_v19, %v987_v42  ;;  %v950_v47 = vpop.permute.xlu1 %949  ;;  %v1117_v49 = vsel %vm1116_vm13, %v1067_v38, %v1115_v33  ;;  %v1217_v50 = vsel %vm1116_vm13, %v1172_v40, %v1216_v35  ;;  %v988_v54 = vsel %vm979_vm7, %v948_v41, %v971_v43 }
 0x205   :  { %v972_v55 = vrot.slane %v950_v47, 2  ;;  %v1020_v57 = vmax.f32 %v3175_v23, %v988_v54  ;;  %v952_v58 = vpop.permute.xlu0 %951  ;;  %v1119_v48 = vsel %vm1118_vm14, %v1071_v51, %v1117_v49  ;;  %v1218_v52 = vsel %vm1118_vm14, %v1176_v53, %v1217_v50 }
 0x206   :  { %v1075_v12 = vrot.slane %v1019_v45, %v3117_v34  ;;  %v1180_v19 = vrot.slane %v1019_v45, %v3210_v44  ;;  %v973_v61 = vrot.slane %v952_v58, 2 }
 0x207   :  { %v989_v59 = vsel %vm979_vm7, %v950_v47, %v972_v55  ;;  %v1079_v1 = vrot.slane %v1020_v57, %v3117_v34 }
 0x208   :  { %v1021_v62 = vmax.f32 %v3180_v17, %v989_v59  ;;  %v954_v56 = vpop.permute.xlu1 %953  ;;  %v3263_v63 = vsel %vm1120_vm15, %v1075_v12, %v1119_v48  ;;  %v990_v23 = vsel %vm979_vm7, %v952_v58, %v973_v61  ;;  %v1184_v17 = vrot.slane %v1020_v57, %v3210_v44  ;;  %v1332_v59 = vld [vmem:[%s3977_s3 + $0x78] sm:$0xff] }
 0x209   :  { %v974_v2 = vrot.slane %v954_v56, 2  ;;  %1137 = vrot.lane.b32.xlu1 %v3263_v63, %s2665_s18  ;;  %1131 = vrot.lane.b32.xlu0 %v3263_v63, %s2664_s2  ;;  %v1022_v6 = vmax.f32 %v3184_v27, %v990_v23  ;;  %v956_v7 = vpop.permute.xlu0 %955  ;;  %v1219_v11 = vsel %vm1120_vm15, %v1180_v19, %v1218_v52  ;;  %v2478_v61 = vld [vmem:[%s3977_s3 + $0x138] sm:$0xff]  ;;  %v1330_v52 = vld [vmem:[%s3977_s3 + $0x68] sm:$0xff] }
 0x20a   :  { %v1083_v3 = vrot.slane %v1021_v62, %v3117_v34  ;;  %v1188_v5 = vrot.slane %v1021_v62, %v3210_v44  ;;  %v975_v10 = vrot.slane %v956_v7, 2  ;;  %1483 = vmatpush1.msra.mxu0 %v1332_v59  ;;  %v1331_v62 = vld [vmem:[%s3977_s3 + $0x70] sm:$0xff]  ;;  %1402 = vmatpush1.msra.mxu1 %v2478_v61  ;;  %v1329_v23 = vld [vmem:[%s3977_s3 + $0x60] sm:$0xff]  ;;  %v2480_v61 = vld [vmem:[%s3977_s3 + $0x148] sm:$0xff] }
 0x20b   :  { %v991_v60 = vsel %vm979_vm7, %v954_v56, %v974_v2  ;;  %v1087_v0 = vrot.slane %v1022_v6, %v3117_v34  ;;  %v1192_v18 = vrot.slane %v1022_v6, %v3210_v44  ;;  %v2477_v56 = vld [vmem:[%s3977_s3 + $0x130] sm:$0xff]  ;;  %1484 = vmatprep.subr.mxu0 %v2662_v8  ;;  %1403 = vmatprep.subr.mxu1 %v2662_v8  ;;  %v2475_v2 = vld [vmem:[%s3977_s3 + $0x120] sm:$0xff] }
 0x20c   :  { %v1122_v13 = vsel %vm1108_vm8, %v1083_v3, %v1079_v1  ;;  %v1220_v15 = vsel %vm1108_vm8, %v1188_v5, %v1184_v17  ;;  %v958_v21 = vpop.permute.xlu1 %957  ;;  %v1023_v22 = vmax.f32 %v3188_v30, %v991_v60  ;;  %v992_v24 = vsel %vm979_vm7, %v956_v7, %v975_v10  ;;  %1485 = vmatpush1.msra.mxu0 %v1331_v62  ;;  %v2476_v1 = vld [vmem:[%s3977_s3 + $0x128] sm:$0xff]  ;;  %v1328_v17 = vld [vmem:[%s3977_s3 + $0x58] sm:$0xff]  ;;  %v1327_v5 = vld [vmem:[%s3977_s3 + $0x50] sm:$0xff] }
 0x20d   :  { %v976_v27 = vrot.slane %v958_v21, 2  ;;  %1227 = vrot.lane.b32.xlu1 %v1219_v11, %s2666_s19  ;;  %1143 = vrot.lane.b32.xlu0 %v3263_v63, %s2667_s20  ;;  %v1123_v14 = vsel %vm1110_vm9, %v1087_v0, %v1122_v13  ;;  %v1221_v46 = vsel %vm1110_vm9, %v1192_v18, %v1220_v15  ;;  %v1024_v25 = vmax.f32 %v3192_v32, %v992_v24  ;;  %v960_v26 = vpop.permute.xlu0 %959  ;;  %v2474_v3 = vld [vmem:[%s3977_s3 + $0x118] sm:$0xff]  ;;  %v2473_v6 = vld [vmem:[%s3977_s3 + $0x110] sm:$0xff] }
 0x20e   :  { %v1091_v29 = vrot.slane %v1023_v22, %v3117_v34  ;;  %v1196_v30 = vrot.slane %v1023_v22, %v3210_v44  ;;  %v977_v20 = vrot.slane %v960_v26, 2  ;;  %1404 = vmatpush1.msra.mxu1 %v2477_v56  ;;  %1486 = vmatprep.subr.mxu0 %v2662_v8  ;;  %v1326_v7 = vld [vmem:[%s3977_s3 + $0x48] sm:$0xff]  ;;  %v1325_v10 = vld [vmem:[%s3977_s3 + $0x40] sm:$0xff]  ;;  %v1324_v13 = vld [vmem:[%s3977_s3 + $0x38] sm:$0xff] }
 0x20f   :  { %v993_v16 = vsel %vm979_vm7, %v958_v21, %v976_v27  ;;  %v1095_v33 = vrot.slane %v1024_v25, %v3117_v34  ;;  %v1200_v35 = vrot.slane %v1024_v25, %v3210_v44  ;;  %1405 = vmatprep.subr.mxu1 %v2662_v8  ;;  %1487 = vmatpush1.msra.mxu0 %v1330_v52  ;;  %v2472_v60 = vld [vmem:[%s3977_s3 + $0x108] sm:$0xff]  ;;  %v2470_v15 = vld [vmem:[%s3977_s3 + $0xf8] sm:$0xff]  ;;  %v1323_v0 = vld [vmem:[%s3977_s3 + $0x30] sm:$0xff] }
 0x210   :  { %v1025_v38 = vmax.f32 %v3196_v31, %v993_v16  ;;  %v962_v40 = vpop.permute.xlu1 %961  ;;  %v1124_v41 = vsel %vm1112_vm10, %v1091_v29, %v1123_v14  ;;  %v1222_v9 = vsel %vm1112_vm10, %v1196_v30, %v1221_v46  ;;  %v994_v32 = vsel %vm979_vm7, %v960_v26, %v977_v20  ;;  %1406 = vmatpush1.msra.mxu1 %v2476_v1  ;;  %v2469_v18 = vld [vmem:[%s3977_s3 + $0xf0] sm:$0xff]  ;;  %v1322_v21 = vld [vmem:[%s3977_s3 + $0x28] sm:$0xff]  ;;  %v1321_v24 = vld [vmem:[%s3977_s3 + $0x20] sm:$0xff] }
 0x211   :  { %v978_v42 = vrot.slane %v962_v40, 2  ;;  %1239 = vrot.lane.b32.xlu1 %v1219_v11, %s2668_s21  ;;  %1233 = vrot.lane.b32.xlu0 %v1219_v11, %s2669_s22  ;;  %v1125_v43 = vsel %vm1114_vm12, %v1095_v33, %v1124_v41  ;;  %v1223_v47 = vsel %vm1114_vm12, %v1200_v35, %v1222_v9  ;;  %v1026_v49 = vmax.f32 %v3200_v36, %v994_v32  ;;  %v2468_v22 = vld [vmem:[%s3977_s3 + $0xe8] sm:$0xff]  ;;  %v2467_v27 = vld [vmem:[%s3977_s3 + $0xe0] sm:$0xff] }
 0x212   :  { %v1099_v45 = vrot.slane %v1025_v38, %v3117_v34  ;;  %v1204_v31 = vrot.slane %v1025_v38, %v3210_v44  ;;  %1488 = vmatprep.subr.mxu0 %v2662_v8  ;;  %1407 = vmatprep.subr.mxu1 %v2662_v8  ;;  %v1320_v14 = vld [vmem:[%s3977_s3 + $0x18] sm:$0xff]  ;;  %v1319_v25 = vld [vmem:[%s3977_s3 + $0x10] sm:$0xff]  ;;  %v1318_v29 = vld [vmem:[%s3977_s3 + $0x8] sm:$0xff] }
 0x213   :  { %v995_v50 = vsel %vm979_vm7, %v962_v40, %v978_v42  ;;  %v1103_v54 = vrot.slane %v1026_v49, %v3117_v34  ;;  %v1208_v55 = vrot.slane %v1026_v49, %v3210_v44  ;;  %1489 = vmatpush1.msra.mxu0 %v1329_v23  ;;  %1408 = vmatpush1.msra.mxu1 %v2475_v2  ;;  %v2466_v46 = vld [vmem:[%s3977_s3 + $0xd8] sm:$0xff]  ;;  %v2465_v26 = vld [vmem:[%s3977_s3 + $0xd0] sm:$0xff]  ;;  %v2464_v30 = vld [vmem:[%s3977_s3 + $0xc8] sm:$0xff] }
 0x214   :  { %v1027_v51 = vmax.f32 %v3204_v37, %v995_v50  ;;  %v1126_v53 = vsel %vm1116_vm13, %v1099_v45, %v1125_v43  ;;  %v1224_v57 = vsel %vm1116_vm13, %v1204_v31, %v1223_v47  ;;  %1490 = vmatprep.subr.mxu0 %v2662_v8  ;;  %1409 = vmatprep.subr.mxu1 %v2662_v8  ;;  %v1317_v16 = vld [vmem:[%s3977_s3] sm:$0xff]  ;;  %v1340_v33 = vld [vmem:[%s3977_s3 + $0xb8] sm:$0xff]  ;;  %v1339_v38 = vld [vmem:[%s3977_s3 + $0xb0] sm:$0xff] }
 0x215   :  { %1245 = vrot.lane.b32.xlu0 %v1219_v11, %s2670_s23  ;;  %v1127_v58 = vsel %vm1118_vm14, %v1103_v54, %v1126_v53  ;;  %v1225_v37 = vsel %vm1118_vm14, %v1208_v55, %v1224_v57  ;;  %1491 = vmatpush1.msra.mxu0 %v1328_v17  ;;  %v2471_v11 = vld [vmem:[%s3977_s3 + $0x100] sm:$0xff]  ;;  %v2486_v35 = vld [vmem:[%s3977_s3 + $0x178] sm:$0xff]  ;;  %v2485_v40 = vld [vmem:[%s3977_s3 + $0x170] sm:$0xff] }
 0x216   :  { %v1107_v12 = vrot.slane %v1027_v51, %v3117_v34  ;;  %v1212_v36 = vrot.slane %v1027_v51, %v3210_v44  ;;  %1492 = vmatprep.subr.mxu0 %v2662_v8  ;;  %1410 = vmatpush1.msra.mxu1 %v2474_v3  ;;  %v2463_v20 = vld [vmem:[%s3977_s3 + $0xc0] sm:$0xff]  ;;  %v1338_v41 = vld [vmem:[%s3977_s3 + $0xa8] sm:$0xff]  ;;  %v1336_v31 = vld [vmem:[%s3977_s3 + $0x98] sm:$0xff] }
 0x217   :  { %1493 = vmatpush1.msra.mxu0 %v1327_v5  ;;  %1411 = vmatprep.subr.mxu1 %v2662_v8  ;;  %v1337_v9 = vld [vmem:[%s3977_s3 + $0xa0] sm:$0xff]  ;;  %v2484_v45 = vld [vmem:[%s3977_s3 + $0x168] sm:$0xff]  ;;  %v2482_v54 = vld [vmem:[%s3977_s3 + $0x158] sm:$0xff] }
 0x218   :  { %v3317_v19 = vsel %vm1120_vm15, %v1107_v12, %v1127_v58  ;;  %v1226_v48 = vsel %vm1120_vm15, %v1212_v36, %v1225_v37  ;;  %1494 = vmatprep.subr.mxu0 %v2662_v8  ;;  %1412 = vmatpush1.msra.mxu1 %v2473_v6  ;;  %v2483_v47 = vld [vmem:[%s3977_s3 + $0x160] sm:$0xff]  ;;  %v1334_v55 = vld [vmem:[%s3977_s3 + $0x88] sm:$0xff]  ;;  %v2481_v12 = vld [vmem:[%s3977_s3 + $0x150] sm:$0xff] }
 0x219   :  { %1139 = vrot.lane.b32.xlu0 %v3317_v19, %s2665_s18  ;;  %1133 = vrot.lane.b32.xlu1 %v3317_v19, %s2664_s2  ;;  %v1333_v57 = vld [vmem:[%s3977_s3 + $0x80] sm:$0xff] }
 0x21a   :  { %1495 = vmatpush1.msra.mxu0 %v1326_v7  ;;  %1413 = vmatprep.subr.mxu1 %v2662_v8  ;;  %v2479_v52 = vld [vmem:[%s3977_s3 + $0x140] sm:$0xff] }
 0x21b   :  { %1496 = vmatprep.subr.mxu0 %v2662_v8  ;;  %1414 = vmatpush1.msra.mxu1 %v2472_v60 }
 0x21c   :  { %1497 = vmatpush1.msra.mxu0 %v1325_v10  ;;  %1415 = vmatprep.subr.mxu1 %v2662_v8 }
 0x21d   :  { %1229 = vrot.lane.b32.xlu0 %v1226_v48, %s2666_s19  ;;  %1145 = vrot.lane.b32.xlu1 %v3317_v19, %s2667_s20 }
 0x21e   :  { %1498 = vmatprep.subr.mxu0 %v2662_v8  ;;  %1416 = vmatpush1.msra.mxu1 %v2471_v11 }
 0x21f   :  { %1499 = vmatpush1.msra.mxu0 %v1324_v13  ;;  %1417 = vmatprep.subr.mxu1 %v2662_v8 }
 0x220   :  { %1500 = vmatprep.subr.mxu0 %v2662_v8  ;;  %1418 = vmatpush1.msra.mxu1 %v2470_v15 }
 0x221   :  { %1241 = vrot.lane.b32.xlu0 %v1226_v48, %s2668_s21  ;;  %1235 = vrot.lane.b32.xlu1 %v1226_v48, %s2669_s22 }
 0x222   :  { %1501 = vmatpush1.msra.mxu0 %v1323_v0  ;;  %1419 = vmatprep.subr.mxu1 %v2662_v8 }
 0x223   :  { %1502 = vmatprep.subr.mxu0 %v2662_v8  ;;  %1420 = vmatpush1.msra.mxu1 %v2469_v18 }
 0x224   :  { %1503 = vmatpush1.msra.mxu0 %v1322_v21  ;;  %1421 = vmatprep.subr.mxu1 %v2662_v8 }
 0x225   :  { %1247 = vrot.lane.b32.xlu1 %v1226_v48, %s2670_s23  ;;  %1504 = vmatprep.subr.mxu0 %v2662_v8 }
 0x226   :  { %1422 = vmatpush1.msra.mxu1 %v2468_v22  ;;  %1505 = vmatpush1.msra.mxu0 %v1321_v24  ;;  %v2532_v22 = vld [vmem:[%s3977_s3 + $0x2b8] sm:$0xff] }
 0x227   :  { %1423 = vmatprep.subr.mxu1 %v2662_v8  ;;  %1506 = vmatprep.subr.mxu0 %v2662_v8 }
 0x228   :  { %1424 = vmatpush1.msra.mxu1 %v2467_v27  ;;  %1507 = vmatpush1.msra.mxu0 %v1320_v14 }
 0x229   :  { %1425 = vmatprep.subr.mxu1 %v2662_v8  ;;  %1508 = vmatprep.subr.mxu0 %v2662_v8 }
 0x22a   :  { %1426 = vmatpush1.msra.mxu1 %v2466_v46  ;;  %1509 = vmatpush1.msra.mxu0 %v1319_v25 }
 0x22b   :  { %1427 = vmatprep.subr.mxu1 %v2662_v8  ;;  %1510 = vmatprep.subr.mxu0 %v2662_v8 }
 0x22c   :  { %1428 = vmatpush1.msra.mxu1 %v2465_v26  ;;  %1511 = vmatpush1.msra.mxu0 %v1318_v29 }
 0x22d   :  { %1429 = vmatprep.subr.mxu1 %v2662_v8  ;;  %1512 = vmatprep.subr.mxu0 %v2662_v8 }
 0x22e   :  { %1430 = vmatpush1.msra.mxu1 %v2464_v30  ;;  %1513 = vmatpush1.msra.mxu0 %v1317_v16  ;;  %v2531_v30 = vld [vmem:[%s3977_s3 + $0x2b0] sm:$0xff] }
 0x22f   :  { %1431 = vmatprep.subr.mxu1 %v2662_v8  ;;  %1530 = vmatprep.subr.mxu0 %v2662_v8 }
 0x230   :  { %1432 = vmatpush1.msra.mxu1 %v2463_v20  ;;  %1531 = vmatpush2.msra.mxu0 %v1340_v33 }
 0x231   :  { %1449 = vmatprep.subr.mxu1 %v2662_v8  ;;  %1532 = vmatprep.subr.mxu0 %v2662_v8 }
 0x232   :  { %1450 = vmatpush2.msra.mxu1 %v2486_v35  ;;  %1533 = vmatpush2.msra.mxu0 %v1339_v38  ;;  %v2506_v38 = vld [vmem:[%s3977_s3 + $0x1f8] sm:$0xff] }
 0x233   :  { %1451 = vmatprep.subr.mxu1 %v2662_v8  ;;  %1534 = vmatprep.subr.mxu0 %v2662_v8 }
 0x234   :  { %1452 = vmatpush2.msra.mxu1 %v2485_v40  ;;  %1535 = vmatpush2.msra.mxu0 %v1338_v41  ;;  %v2530_v40 = vld [vmem:[%s3977_s3 + $0x2a8] sm:$0xff] }
 0x235   :  { %1453 = vmatprep.subr.mxu1 %v2662_v8  ;;  %1536 = vmatprep.subr.mxu0 %v2662_v8 }
 0x236   :  { %1537 = vmatpush2.msra.mxu0 %v1337_v9  ;;  %1454 = vmatpush2.msra.mxu1 %v2484_v45  ;;  %v2505_v9 = vld [vmem:[%s3977_s3 + $0x1f0] sm:$0xff]  ;;  %v2528_v45 = vld [vmem:[%s3977_s3 + $0x298] sm:$0xff] }
 0x237   :  { %1538 = vmatprep.subr.mxu0 %v2662_v8  ;;  %1455 = vmatprep.subr.mxu1 %v2662_v8 }
 0x238   :  { %1539 = vmatpush2.msra.mxu0 %v1336_v31  ;;  %1456 = vmatpush2.msra.mxu1 %v2483_v47  ;;  %v2503_v31 = vld [vmem:[%s3977_s3 + $0x1e0] sm:$0xff]  ;;  %v2527_v47 = vld [vmem:[%s3977_s3 + $0x290] sm:$0xff] }
 0x239   :  { %1540 = vmatprep.subr.mxu0 %v2662_v8  ;;  %1457 = vmatprep.subr.mxu1 %v2662_v8 }
 0x23a   :  { %1458 = vmatpush2.msra.mxu1 %v2482_v54  ;;  %v2525_v54 = vld [vmem:[%s3977_s3 + $0x280] sm:$0xff] }
 0x23b   :  { %1459 = vmatprep.subr.mxu1 %v2662_v8 }
 0x23c   :  { %1460 = vmatpush2.msra.mxu1 %v2481_v12 }
 0x23d   :  { %1461 = vmatprep.subr.mxu1 %v2662_v8 }
 0x23e   :  { %1462 = vmatpush2.msra.mxu1 %v2480_v61 }
 0x23f   :  { %1463 = vmatprep.subr.mxu1 %v2662_v8 }
 0x240   :  { %1464 = vmatpush2.msra.mxu1 %v2479_v52 }
 0x241   :  { %1617 = vmatprep.subr.mxu1 %v2662_v8 }
 0x27b   :  { %v1132_v32 = vpop.permute.xlu0 %1131  ;;  %v1138_v42 = vpop.permute.xlu1 %1137 }
 0x27c   :  { %v1252_v43 = vsel %vm1251_vm5, %v3263_v63, %v1132_v32  ;;  %v1335_v63 = vld [vmem:[%s3977_s3 + $0x90] sm:$0xff]  ;;  %v2529_v32 = vld [vmem:[%s3977_s3 + $0x2a0] sm:$0xff] }
 0x27d   :  { %v1255_v49 = vsel %vm1254_vm11, %v1252_v43, %v1138_v42  ;;  %1541 = vmatpush2.msra.mxu0 %v1335_v63  ;;  %v2504_v43 = vld [vmem:[%s3977_s3 + $0x1e8] sm:$0xff] }
 0x27e   :  { %1542 = vmatprep.subr.mxu0 %v2662_v8 }
 0x27f   :  { %v1144_v50 = vpop.permute.xlu0 %1143  ;;  %v1228_v51 = vpop.permute.xlu1 %1227  ;;  %1543 = vmatpush2.msra.mxu0 %v1334_v55  ;;  %v2500_v55 = vld [vmem:[%s3977_s3 + $0x1c8] sm:$0xff] }
 0x280   :  { %v1258_v53 = vsel %vm1257_vm0, %v1255_v49, %v1144_v50  ;;  %1544 = vmatprep.subr.mxu0 %v2662_v8  ;;  %v2502_v49 = vld [vmem:[%s3977_s3 + $0x1d8] sm:$0xff]  ;;  %v2526_v50 = vld [vmem:[%s3977_s3 + $0x288] sm:$0xff] }
 0x281   :  { %v1261_v58 = vsel %vm1260_vm1, %v1258_v53, %v1228_v51  ;;  %1545 = vmatpush2.msra.mxu0 %v1333_v57  ;;  %v2501_v53 = vld [vmem:[%s3977_s3 + $0x1d0] sm:$0xff] }
 0x282   :  { %1754 = vmatprep.subr.mxu0 %v2662_v8 }
 0x283   :  { %v1234_v36 = vpop.permute.xlu0 %1233  ;;  %v1240_v59 = vpop.permute.xlu1 %1239 }
 0x284   :  { %v1263_v37 = vsel %vm122_vm6, %v1261_v58, %v1234_v36  ;;  %v2524_v58 = vld [vmem:[%s3977_s3 + $0x278] sm:$0xff]  ;;  %v2499_v36 = vld [vmem:[%s3977_s3 + $0x1c0] sm:$0xff] }
 0x285   :  { %v1266_v48 = vsel %vm1265_vm2, %v1263_v37, %v1240_v59 }
 0x287   :  { %v1246_v62 = vpop.permute.xlu0 %1245 }
 0x288   :  { %v1268_v56 = vsel %vm979_vm7, %v1266_v48, %v1246_v62 }
 0x289   :  { %v1293_v1 = vrot.slane %v1268_v56, 6 }
 0x28b   :  { %v1140_v23 = vpop.permute.xlu0 %1139  ;;  %1295 = vrot.lane.b32.xlu0 %v1293_v1, %s2668_s21  ;;  %v1134_v2 = vpop.permute.xlu1 %1133 }
 0x28c   :  { %v1253_v17 = vsel %vm1251_vm5, %v3317_v19, %v1134_v2  ;;  %vm1307_vm5 = vcmask 254976  }
 0x28d   :  { %v1256_v5 = vsel %vm1254_vm11, %v1253_v17, %v1140_v23  ;;  %vm1305_vm11 = vcmask 1041664  }
 0x28f   :  { %v1230_v3 = vpop.permute.xlu0 %1229  ;;  %v1146_v6 = vpop.permute.xlu1 %1145 }
 0x290   :  { %v1259_v7 = vsel %vm1257_vm0, %v1256_v5, %v1146_v6 }
 0x291   :  { %v1262_v60 = vsel %vm1260_vm1, %v1259_v7, %v1230_v3  ;;  %v2523_v7 = vld [vmem:[%s3977_s3 + $0x270] sm:$0xff] }
 0x293   :  { %v1236_v10 = vpop.permute.xlu1 %1235  ;;  %v1242_v11 = vpop.permute.xlu0 %1241 }
 0x294   :  { %v1264_v13 = vsel %vm122_vm6, %v1262_v60, %v1236_v10  ;;  %vm1357_vm6 = vcmask 1046528  }
 0x295   :  { %v1267_v15 = vsel %vm1265_vm2, %v1264_v13, %v1242_v11  ;;  %v2498_v13 = vld [vmem:[%s3977_s3 + $0x1b8] sm:$0xff] }
 0x297   :  { %v1248_v0 = vpop.permute.xlu1 %1247 }
 0x298   :  { %v1269_v18 = vsel %vm979_vm7, %v1267_v15, %v1248_v0  ;;  %vm1710_vm7 = vcmask 1044480   ;;  %v2522_v15 = vld [vmem:[%s3977_s3 + $0x268] sm:$0xff]  ;;  %v2497_v0 = vld [vmem:[%s3977_s3 + $0x1b0] sm:$0xff] }
 0x299   :  { %v1294_v21 = vrot.slane %v1269_v18, 6 }
 0x29b   :  { %1297 = vrot.lane.b32.xlu1 %v1294_v21, %s2668_s21  ;;  %v2521_v21 = vld [vmem:[%s3977_s3 + $0x260] sm:$0xff] }
 0x2fd   :  { %v1296_v19 = vpop.permute.xlu0 %1295 }
 0x2fe   :  { %1302 = vst.msk [vmem:[#allocation3] sm:$0xfc] %vm1301_vm3, %v1296_v19 }
 0x2ff   :  { %1304 = vst.msk [vmem:[#allocation3 + $0x8] sm:$0xfc] %vm1303_vm4, %v1296_v19 }
 0x300   :  { %1306 = vst.msk [vmem:[#allocation3 + $0x10] sm:$0x3] %vm1305_vm11, %v1296_v19 }
 0x301   :  { %1308 = vst.msk [vmem:[#allocation3 + $0x18] sm:$0x3] %vm1307_vm5, %v1296_v19  ;;  %v2496_v19 = vld [vmem:[%s3977_s3 + $0x1a8] sm:$0xff] }
 0x305   :  { %v1313_v27 = vld [vmem:[#allocation3] sm:$0xff] }
 0x306   :  { %v1314_v24 = vld [vmem:[#allocation3 + $0x8] sm:$0xff]  ;;  %v1341_v26 = vld [vmem:[#allocation3] sm:$0xfe] }
 0x307   :  { %v1342_v14 = vld [vmem:[#allocation3 + $0x8] sm:$0xfe]  ;;  %2489 = vmatprep.mubr.msk.f32.mxu0 %vm1260_vm1, %v1314_v24  ;;  %v1343_v16 = vld [vmem:[#allocation3 + $0x10] sm:$0x1]  ;;  %v1358_v20 = vrot.slane %v1341_v26, 1 }
 0x308   :  { %v1344_v46 = vld [vmem:[#allocation3 + $0x18] sm:$0x1]  ;;  %v1361_v25 = vrot.slane %v1342_v14, 1  ;;  %1547 = vmatmul.mubr.f32.vlgmr.msra.gmra.mxu0 %v1313_v27  ;;  %v1359_v33 = vrot.slane %v1343_v16, 1  ;;  %v1695_v51 = vld [vmem:[#allocation3 + $0x8] sm:$0xf8] }
 0x309   :  { %v1362_v29 = vrot.slane %v1344_v46, 1  ;;  %1755 = vmatpush1.msra.mxu0 %v2532_v22  ;;  %v1697_v63 = vld [vmem:[#allocation3 + $0x18] sm:$0x7]  ;;  %v1714_v12 = vrot.slane %v1695_v51, 3  ;;  %v1558_v61 = vld [vmem:[#allocation3 + $0x8] sm:$0xfc] }
 0x30a   :  { %1756 = vmatprep.subr.mxu0 %v2662_v8  ;;  %v1360_v41 = vsel %vm1357_vm6, %v1358_v20, %v1359_v33  ;;  %v1715_v37 = vrot.slane %v1697_v63, 3  ;;  %v1560_v17 = vld [vmem:[#allocation3 + $0x18] sm:$0x3]  ;;  %v1577_v10 = vrot.slane %v1558_v61, 2  ;;  %v2520_v22 = vld [vmem:[%s3977_s3 + $0x258] sm:$0xff]  ;;  %v2495_v24 = vld [vmem:[%s3977_s3 + $0x1a0] sm:$0xff] }
 0x30b   :  { %v1363_v35 = vsel %vm1357_vm6, %v1361_v25, %v1362_v29  ;;  %1757 = vmatpush1.msra.mxu0 %v2531_v30  ;;  %v1578_v11 = vrot.slane %v1560_v17, 2  ;;  %v2519_v27 = vld [vmem:[%s3977_s3 + $0x250] sm:$0xff]  ;;  %v2494_v14 = vld [vmem:[%s3977_s3 + $0x198] sm:$0xff]  ;;  %v2518_v46 = vld [vmem:[%s3977_s3 + $0x248] sm:$0xff] }
 0x30c   :  { %2487 = vmatprep.mubr.msk.f32.mxu1 %vm1260_vm1, %v1363_v35  ;;  %1758 = vmatprep.subr.mxu0 %v2662_v8  ;;  %v1716_v6 = vsel %vm1710_vm7, %v1714_v12, %v1715_v37  ;;  %v2493_v25 = vld [vmem:[%s3977_s3 + $0x190] sm:$0xff]  ;;  %v2517_v26 = vld [vmem:[%s3977_s3 + $0x240] sm:$0xff]  ;;  %v2492_v29 = vld [vmem:[%s3977_s3 + $0x188] sm:$0xff] }
 0x30d   :  { %1466 = vmatmul.mubr.f32.vlgmr.msra.gmra.mxu1 %v1360_v41  ;;  %1759 = vmatpush1.msra.mxu0 %v2530_v40  ;;  %v1298_v42 = vpop.permute.xlu1 %1297  ;;  %v2540_v30 = vld [vmem:[%s3977_s3 + $0x2f8] sm:$0xff]  ;;  %v2491_v16 = vld [vmem:[%s3977_s3 + $0x180] sm:$0xff]  ;;  %v2539_v20 = vld [vmem:[%s3977_s3 + $0x2f0] sm:$0xff] }
 0x30e   :  { %1618 = vmatpush1.msra.mxu1 %v2506_v38  ;;  %1760 = vmatprep.subr.mxu0 %v2662_v8  ;;  %1309 = vst.msk [vmem:[#allocation3 + $0x20] sm:$0xfc] %vm1301_vm3, %v1298_v42  ;;  %vm1573_vm3 = vcmask 1045504   ;;  %v2514_v33 = vld [vmem:[%s3977_s3 + $0x238] sm:$0xff]  ;;  %v2538_v35 = vld [vmem:[%s3977_s3 + $0x2e8] sm:$0xff]  ;;  %v2513_v38 = vld [vmem:[%s3977_s3 + $0x230] sm:$0xff] }
 0x30f   :  { %1619 = vmatprep.subr.mxu1 %v2662_v8  ;;  %1761 = vmatpush1.msra.mxu0 %v2529_v32  ;;  %1310 = vst.msk [vmem:[#allocation3 + $0x28] sm:$0xfc] %vm1303_vm4, %v1298_v42  ;;  %v1579_v18 = vsel %vm1573_vm3, %v1577_v10, %v1578_v11  ;;  %v2537_v40 = vld [vmem:[%s3977_s3 + $0x2e0] sm:$0xff]  ;;  %v2512_v41 = vld [vmem:[%s3977_s3 + $0x228] sm:$0xff]  ;;  %v2558_v11 = vld [vmem:[%s3977_s3 + $0x378] sm:$0xff]  ;;  %vm1847_vm4 = vcmask 1043456  }
 0x310   :  { %1620 = vmatpush1.msra.mxu1 %v2505_v9  ;;  %1311 = vst.msk [vmem:[#allocation3 + $0x30] sm:$0x3] %vm1305_vm11, %v1298_v42  ;;  %1762 = vmatprep.subr.mxu0 %v2662_v8  ;;  %v2536_v9 = vld [vmem:[%s3977_s3 + $0x2d8] sm:$0xff]  ;;  %v2511_v32 = vld [vmem:[%s3977_s3 + $0x220] sm:$0xff] }
 0x311   :  { %1312 = vst.msk [vmem:[#allocation3 + $0x38] sm:$0x3] %vm1307_vm5, %v1298_v42  ;;  %1621 = vmatprep.subr.mxu1 %v2662_v8  ;;  %1763 = vmatpush1.msra.mxu0 %v2528_v45  ;;  %v2535_v42 = vld [vmem:[%s3977_s3 + $0x2d0] sm:$0xff]  ;;  %v2534_v45 = vld [vmem:[%s3977_s3 + $0x2c8] sm:$0xff]  ;;  %v2533_v63 = vld [vmem:[%s3977_s3 + $0x2c0] sm:$0xff] }
 0x312   :  { %1622 = vmatpush1.msra.mxu1 %v2504_v43  ;;  %1764 = vmatprep.subr.mxu0 %v2662_v8  ;;  %v2510_v43 = vld [vmem:[%s3977_s3 + $0x218] sm:$0xff] }
 0x313   :  { %1623 = vmatprep.subr.mxu1 %v2662_v8  ;;  %1765 = vmatpush1.msra.mxu0 %v2527_v47  ;;  %v1696_v47 = vld [vmem:[#allocation3 + $0x10] sm:$0x7] }
 0x314   :  { %1624 = vmatpush1.msra.mxu1 %v2503_v31  ;;  %1766 = vmatprep.subr.mxu0 %v2662_v8  ;;  %v1694_v31 = vld [vmem:[#allocation3] sm:$0xf8] }
 0x315   :  { %1625 = vmatprep.subr.mxu1 %v2662_v8  ;;  %1767 = vmatpush1.msra.mxu0 %v2526_v50  ;;  %v1315_v48 = vld [vmem:[#allocation3 + $0x20] sm:$0xff]  ;;  %v1711_v12 = vrot.slane %v1694_v31, 3  ;;  %v2563_v31 = vld [vmem:[%s3977_s3 + $0x3a0] sm:$0xff] }
 0x316   :  { %1626 = vmatpush1.msra.mxu1 %v2502_v49  ;;  %1768 = vmatprep.subr.mxu0 %v2662_v8  ;;  %v1316_v57 = vld [vmem:[#allocation3 + $0x28] sm:$0xff]  ;;  %v1345_v52 = vld [vmem:[#allocation3 + $0x20] sm:$0xfe] }
 0x317   :  { %1627 = vmatprep.subr.mxu1 %v2662_v8  ;;  %v1346_v59 = vld [vmem:[#allocation3 + $0x28] sm:$0xfe]  ;;  %1769 = vmatpush1.msra.mxu0 %v2525_v54  ;;  %v1347_v23 = vld [vmem:[#allocation3 + $0x30] sm:$0x1]  ;;  %v1364_v2 = vrot.slane %v1345_v52, 1  ;;  %v2509_v49 = vld [vmem:[%s3977_s3 + $0x210] sm:$0xff] }
 0x318   :  { %1628 = vmatpush1.msra.mxu1 %v2501_v53  ;;  %v1348_v62 = vld [vmem:[#allocation3 + $0x38] sm:$0x1]  ;;  %v1367_v56 = vrot.slane %v1346_v59, 1  ;;  %2490 = vmatprep.mubr.msk.f32.mxu0 %vm1260_vm1, %v1316_v57  ;;  %v1365_v3 = vrot.slane %v1347_v23, 1  ;;  %v1699_v50 = vld [vmem:[#allocation3 + $0x28] sm:$0xf8] }
 0x319   :  { %1629 = vmatprep.subr.mxu1 %v2662_v8  ;;  %v1368_v1 = vrot.slane %v1348_v62, 1  ;;  %1770 = vmatprep.subr.mxu0 %v2662_v8  ;;  %v1701_v51 = vld [vmem:[#allocation3 + $0x38] sm:$0x7]  ;;  %v1557_v54 = vld [vmem:[#allocation3] sm:$0xfc]  ;;  %v1712_v57 = vrot.slane %v1696_v47, 3 }
 0x31a   :  { %1630 = vmatpush1.msra.mxu1 %v2500_v55  ;;  %1552 = vmatmul.mubr.f32.gmra.mxu0 %v1315_v48  ;;  %v1366_v60 = vsel %vm1357_vm6, %v1364_v2, %v1365_v3  ;;  %v2508_v53 = vld [vmem:[%s3977_s3 + $0x208] sm:$0xff]  ;;  %v1559_v55 = vld [vmem:[#allocation3 + $0x10] sm:$0x3]  ;;  %v1720_v37 = vrot.slane %v1699_v50, 3  ;;  %v1721_v59 = vrot.slane %v1701_v51, 3  ;;  %v2562_v47 = vld [vmem:[%s3977_s3 + $0x398] sm:$0xff] }
 0x31b   :  { %1631 = vmatprep.subr.mxu1 %v2662_v8  ;;  %v1369_v5 = vsel %vm1357_vm6, %v1367_v56, %v1368_v1  ;;  %1771 = vmatpush1.msra.mxu0 %v2524_v58  ;;  %v1562_v58 = vld [vmem:[#allocation3 + $0x28] sm:$0xfc]  ;;  %v1698_v61 = vld [vmem:[#allocation3 + $0x20] sm:$0xf8]  ;;  %v1700_v48 = vld [vmem:[#allocation3 + $0x30] sm:$0x7]  ;;  %v1713_v3 = vsel %vm1710_vm7, %v1711_v12, %v1712_v57 }
 0x31c   :  { %1632 = vmatpush1.msra.mxu1 %v2499_v36  ;;  %1772 = vmatprep.subr.mxu0 %v2662_v8  ;;  %v1564_v36 = vld [vmem:[#allocation3 + $0x38] sm:$0x3]  ;;  %v2507_v62 = vld [vmem:[%s3977_s3 + $0x200] sm:$0xff]  ;;  %v1574_v56 = vrot.slane %v1557_v54, 2  ;;  %v1575_v52 = vrot.slane %v1559_v55, 2  ;;  %v1583_v1 = vrot.slane %v1562_v58, 2  ;;  %v1722_v10 = vsel %vm1710_vm7, %v1720_v37, %v1721_v59 }
 0x31d   :  { %2541 = vmatprep.mubr.msk.f32.mxu0 %vm1260_vm1, %v1716_v6  ;;  %2488 = vmatprep.mubr.msk.f32.mxu1 %vm1260_vm1, %v1369_v5  ;;  %v1584_v23 = vrot.slane %v1564_v36, 2  ;;  %v1561_v2 = vld [vmem:[#allocation3 + $0x20] sm:$0xfc]  ;;  %v1563_v17 = vld [vmem:[#allocation3 + $0x30] sm:$0x3]  ;;  %v1717_v5 = vrot.slane %v1698_v61, 3 }
 0x31e   :  { %1633 = vmatprep.subr.mxu1 %v2662_v8  ;;  %1773 = vmatpush1.msra.mxu0 %v2523_v7  ;;  %v1718_v6 = vrot.slane %v1700_v48, 3  ;;  %v1832_v7 = vld [vmem:[#allocation3 + $0x8] sm:$0xf0]  ;;  %v1831_v50 = vld [vmem:[#allocation3] sm:$0xf0]  ;;  %v2560_v54 = vld [vmem:[%s3977_s3 + $0x388] sm:$0xff] }
 0x31f   :  { %1471 = vmatmul.mubr.f32.gmra.mxu1 %v1366_v60  ;;  %1774 = vmatprep.subr.mxu0 %v2662_v8  ;;  %v1834_v60 = vld [vmem:[#allocation3 + $0x18] sm:$0xf]  ;;  %v1833_v51 = vld [vmem:[#allocation3 + $0x10] sm:$0xf]  ;;  %v1848_v12 = vrot.slane %v1831_v50, 4 }
 0x320   :  { %1634 = vmatpush1.msra.mxu1 %v2498_v13  ;;  %2515 = vmatprep.mubr.msk.f32.mxu1 %vm1260_vm1, %v1579_v18  ;;  %v1576_v13 = vsel %vm1573_vm3, %v1574_v56, %v1575_v52  ;;  %v1585_v18 = vsel %vm1573_vm3, %v1583_v1, %v1584_v23  ;;  %v2559_v55 = vld [vmem:[%s3977_s3 + $0x380] sm:$0xff]  ;;  %v1849_v57 = vrot.slane %v1833_v51, 4  ;;  %v1835_v37 = vld [vmem:[#allocation3 + $0x20] sm:$0xf0] }
 0x321   :  { %1635 = vmatprep.subr.mxu1 %v2662_v8  ;;  %1775 = vmatpush1.msra.mxu0 %v2522_v15  ;;  %v1580_v15 = vrot.slane %v1561_v2, 2  ;;  %v1837_v59 = vld [vmem:[#allocation3 + $0x30] sm:$0xf]  ;;  %v1854_v48 = vrot.slane %v1835_v37, 4 }
 0x322   :  { %1636 = vmatpush1.msra.mxu1 %v2497_v0  ;;  %1776 = vmatprep.subr.mxu0 %v2662_v8  ;;  %v1581_v0 = vrot.slane %v1563_v17, 2  ;;  %v1850_v61 = vsel %vm1847_vm4, %v1848_v12, %v1849_v57 }
 0x323   :  { %1637 = vmatprep.subr.mxu1 %v2662_v8  ;;  %1777 = vmatpush1.msra.mxu0 %v2521_v21  ;;  %v2557_v21 = vld [vmem:[%s3977_s3 + $0x370] sm:$0xff] }
 0x324   :  { %1638 = vmatpush1.msra.mxu1 %v2496_v19  ;;  %1778 = vmatprep.subr.mxu0 %v2662_v8  ;;  %v1851_v19 = vrot.slane %v1832_v7, 4 }
 0x325   :  { %1639 = vmatprep.subr.mxu1 %v2662_v8  ;;  %1779 = vmatpush1.msra.mxu0 %v2520_v22  ;;  %v1852_v22 = vrot.slane %v1834_v60, 4 }
 0x326   :  { %1640 = vmatpush1.msra.mxu1 %v2495_v24  ;;  %1780 = vmatprep.subr.mxu0 %v2662_v8  ;;  %v1719_v24 = vsel %vm1710_vm7, %v1717_v5, %v1718_v6 }
 0x327   :  { %1641 = vmatprep.subr.mxu1 %v2662_v8  ;;  %1781 = vmatpush1.msra.mxu0 %v2519_v27  ;;  %v2556_v27 = vld [vmem:[%s3977_s3 + $0x368] sm:$0xff] }
 0x328   :  { %1642 = vmatpush1.msra.mxu1 %v2494_v14  ;;  %1782 = vmatprep.subr.mxu0 %v2662_v8  ;;  %v1582_v14 = vsel %vm1573_vm3, %v1580_v15, %v1581_v0 }
 0x329   :  { %1643 = vmatprep.subr.mxu1 %v2662_v8  ;;  %1783 = vmatpush1.msra.mxu0 %v2518_v46  ;;  %v1853_v46 = vsel %vm1847_vm4, %v1851_v19, %v1852_v22 }
 0x32a   :  { %1644 = vmatpush1.msra.mxu1 %v2493_v25  ;;  %1784 = vmatprep.subr.mxu0 %v2662_v8  ;;  %v2555_v25 = vld [vmem:[%s3977_s3 + $0x360] sm:$0xff] }
 0x32b   :  { %1645 = vmatprep.subr.mxu1 %v2662_v8  ;;  %1785 = vmatpush1.msra.mxu0 %v2517_v26  ;;  %v2554_v26 = vld [vmem:[%s3977_s3 + $0x358] sm:$0xff] }
 0x32c   :  { %1646 = vmatpush1.msra.mxu1 %v2492_v29  ;;  %1802 = vmatprep.subr.mxu0 %v2662_v8  ;;  %v2553_v29 = vld [vmem:[%s3977_s3 + $0x350] sm:$0xff] }
 0x32d   :  { %1647 = vmatprep.subr.mxu1 %v2662_v8  ;;  %1803 = vmatpush2.msra.mxu0 %v2540_v30  ;;  %v2552_v30 = vld [vmem:[%s3977_s3 + $0x348] sm:$0xff] }
 0x32e   :  { %1648 = vmatpush1.msra.mxu1 %v2491_v16  ;;  %1804 = vmatprep.subr.mxu0 %v2662_v8  ;;  %v2551_v16 = vld [vmem:[%s3977_s3 + $0x340] sm:$0xff] }
 0x32f   :  { %1665 = vmatprep.subr.mxu1 %v2662_v8  ;;  %1805 = vmatpush2.msra.mxu0 %v2539_v20  ;;  %v2550_v20 = vld [vmem:[%s3977_s3 + $0x338] sm:$0xff] }
 0x330   :  { %1666 = vmatpush2.msra.mxu1 %v2514_v33  ;;  %1806 = vmatprep.subr.mxu0 %v2662_v8  ;;  %v2549_v33 = vld [vmem:[%s3977_s3 + $0x330] sm:$0xff] }
 0x331   :  { %1667 = vmatprep.subr.mxu1 %v2662_v8  ;;  %1807 = vmatpush2.msra.mxu0 %v2538_v35  ;;  %v2548_v35 = vld [vmem:[%s3977_s3 + $0x328] sm:$0xff] }
 0x332   :  { %1668 = vmatpush2.msra.mxu1 %v2513_v38  ;;  %1808 = vmatprep.subr.mxu0 %v2662_v8  ;;  %v2547_v38 = vld [vmem:[%s3977_s3 + $0x320] sm:$0xff] }
 0x333   :  { %1669 = vmatprep.subr.mxu1 %v2662_v8  ;;  %1809 = vmatpush2.msra.mxu0 %v2537_v40  ;;  %v2546_v40 = vld [vmem:[%s3977_s3 + $0x318] sm:$0xff] }
 0x334   :  { %1670 = vmatpush2.msra.mxu1 %v2512_v41  ;;  %1810 = vmatprep.subr.mxu0 %v2662_v8  ;;  %v2545_v41 = vld [vmem:[%s3977_s3 + $0x310] sm:$0xff] }
 0x335   :  { %1671 = vmatprep.subr.mxu1 %v2662_v8  ;;  %1811 = vmatpush2.msra.mxu0 %v2536_v9  ;;  %v2544_v9 = vld [vmem:[%s3977_s3 + $0x308] sm:$0xff] }
 0x336   :  { %1672 = vmatpush2.msra.mxu1 %v2511_v32  ;;  %1812 = vmatprep.subr.mxu0 %v2662_v8  ;;  %v2543_v32 = vld [vmem:[%s3977_s3 + $0x300] sm:$0xff] }
 0x337   :  { %1673 = vmatprep.subr.mxu1 %v2662_v8  ;;  %1813 = vmatpush2.msra.mxu0 %v2535_v42  ;;  %v2566_v42 = vld [vmem:[%s3977_s3 + $0x3b8] sm:$0xff] }
 0x338   :  { %1674 = vmatpush2.msra.mxu1 %v2510_v43  ;;  %1814 = vmatprep.subr.mxu0 %v2662_v8  ;;  %v2565_v43 = vld [vmem:[%s3977_s3 + $0x3b0] sm:$0xff] }
 0x339   :  { %1675 = vmatprep.subr.mxu1 %v2662_v8  ;;  %1815 = vmatpush2.msra.mxu0 %v2534_v45  ;;  %v2564_v45 = vld [vmem:[%s3977_s3 + $0x3a8] sm:$0xff] }
 0x33a   :  { %1676 = vmatpush2.msra.mxu1 %v2509_v49  ;;  %1816 = vmatprep.subr.mxu0 %v2662_v8  ;;  %v2561_v49 = vld [vmem:[%s3977_s3 + $0x390] sm:$0xff] }
 0x33b   :  { %1677 = vmatprep.subr.mxu1 %v2662_v8  ;;  %1817 = vmatpush2.msra.mxu0 %v2533_v63  ;;  %v1836_v63 = vld [vmem:[#allocation3 + $0x28] sm:$0xf0] }
 0x33c   :  { %1678 = vmatpush2.msra.mxu1 %v2508_v53  ;;  %1819 = vmatmul.mubr.f32.vlgmr.msra.gmra.mxu0 %v1713_v3  ;;  %v1838_v53 = vld [vmem:[#allocation3 + $0x38] sm:$0xf]  ;;  %v1857_v58 = vrot.slane %v1836_v63, 4 }
 0x33d   :  { %1679 = vmatprep.subr.mxu1 %v2662_v8  ;;  %2542 = vmatprep.mubr.msk.f32.mxu0 %vm1260_vm1, %v1722_v10  ;;  %v1858_v36 = vrot.slane %v1838_v53, 4 }
 0x33e   :  { %1680 = vmatpush2.msra.mxu1 %v2507_v62  ;;  %2593 = vmatprep.subr.mxu0 %v2662_v8  ;;  %v1855_v62 = vrot.slane %v1837_v59, 4 }
 0x33f   :  { %1682 = vmatmul.mubr.f32.vlgmr.msra.gmra.mxu1 %v1576_v13  ;;  %1891 = vmatprep.subr.mxu1 %v2662_v8  ;;  %v1859_v56 = vsel %vm1847_vm4, %v1857_v58, %v1858_v36 }
 0x340   :  { %2516 = vmatprep.mubr.msk.f32.mxu1 %vm1260_vm1, %v1585_v18  ;;  %1892 = vmatpush1.msra.mxu1 %v2558_v11  ;;  %v1856_v52 = vsel %vm1847_vm4, %v1854_v48, %v1855_v62 }
 0x341   :  { %1824 = vmatmul.mubr.f32.gmra.mxu0 %v1719_v24  ;;  %1893 = vmatprep.subr.mxu1 %v2662_v8 }
 0x342   :  { %1894 = vmatpush1.msra.mxu1 %v2557_v21 }
 0x343   :  { %1687 = vmatmul.mubr.f32.gmra.mxu1 %v1582_v14  ;;  %1895 = vmatprep.subr.mxu1 %v2662_v8 }
 0x344   :  { %1896 = vmatpush1.msra.mxu1 %v2556_v27  ;;  %2567 = vmatprep.mubr.msk.f32.mxu1 %vm1260_vm1, %v1853_v46 }
 0x345   :  { %1897 = vmatprep.subr.mxu1 %v2662_v8 }
 0x346   :  { %1898 = vmatpush1.msra.mxu1 %v2555_v25  ;;  %v2569_v25 = vld [vmem:[%s3978_s4] ss:$0 sm:$0xff]  ;;  %s2671_s4 = smov 122  }
 0x347   :  { %1899 = vmatprep.subr.mxu1 %v2662_v8 }
 0x348   :  { %1900 = vmatpush1.msra.mxu1 %v2554_v26 }
 0x349   :  { %1901 = vmatprep.subr.mxu1 %v2662_v8 }
 0x34a   :  { %1902 = vmatpush1.msra.mxu1 %v2553_v29 }
 0x34b   :  { %1903 = vmatprep.subr.mxu1 %v2662_v8 }
 0x34c   :  { %1904 = vmatpush1.msra.mxu1 %v2552_v30 }
 0x34d   :  { %1905 = vmatprep.subr.mxu1 %v2662_v8 }
 0x34e   :  { %1906 = vmatpush1.msra.mxu1 %v2551_v16 }
 0x34f   :  { %1907 = vmatprep.subr.mxu1 %v2662_v8 }
 0x350   :  { %1908 = vmatpush1.msra.mxu1 %v2550_v20 }
 0x351   :  { %1909 = vmatprep.subr.mxu1 %v2662_v8 }
 0x352   :  { %1910 = vmatpush1.msra.mxu1 %v2549_v33 }
 0x353   :  { %1911 = vmatprep.subr.mxu1 %v2662_v8 }
 0x354   :  { %1912 = vmatpush1.msra.mxu1 %v2548_v35 }
 0x355   :  { %1913 = vmatprep.subr.mxu1 %v2662_v8 }
 0x356   :  { %1914 = vmatpush1.msra.mxu1 %v2547_v38 }
 0x357   :  { %1915 = vmatprep.subr.mxu1 %v2662_v8 }
 0x358   :  { %1916 = vmatpush1.msra.mxu1 %v2546_v40 }
 0x359   :  { %1917 = vmatprep.subr.mxu1 %v2662_v8 }
 0x35a   :  { %1918 = vmatpush1.msra.mxu1 %v2545_v41 }
 0x35b   :  { %1919 = vmatprep.subr.mxu1 %v2662_v8 }
 0x35c   :  { %1920 = vmatpush1.msra.mxu1 %v2544_v9 }
 0x35d   :  { %1921 = vmatprep.subr.mxu1 %v2662_v8 }
 0x35e   :  { %1922 = vmatpush1.msra.mxu1 %v2543_v32 }
 0x35f   :  { %1939 = vmatprep.subr.mxu1 %v2662_v8 }
 0x360   :  { %1940 = vmatpush2.msra.mxu1 %v2566_v42 }
 0x361   :  { %1941 = vmatprep.subr.mxu1 %v2662_v8 }
 0x362   :  { %1942 = vmatpush2.msra.mxu1 %v2565_v43 }
 0x363   :  { %1943 = vmatprep.subr.mxu1 %v2662_v8 }
 0x364   :  { %1944 = vmatpush2.msra.mxu1 %v2564_v45 }
 0x365   :  { %1945 = vmatprep.subr.mxu1 %v2662_v8 }
 0x366   :  { %1946 = vmatpush2.msra.mxu1 %v2563_v31 }
 0x367   :  { %1947 = vmatprep.subr.mxu1 %v2662_v8 }
 0x368   :  { %1948 = vmatpush2.msra.mxu1 %v2562_v47 }
 0x369   :  { %1949 = vmatprep.subr.mxu1 %v2662_v8 }
 0x36a   :  { %1950 = vmatpush2.msra.mxu1 %v2561_v49 }
 0x36b   :  { %1951 = vmatprep.subr.mxu1 %v2662_v8 }
 0x36c   :  { %1952 = vmatpush2.msra.mxu1 %v2560_v54 }
 0x36d   :  { %1953 = vmatprep.subr.mxu1 %v2662_v8 }
 0x36e   :  { %1954 = vmatpush2.msra.mxu1 %v2559_v55 }
 0x36f   :  { %1956 = vmatmul.mubr.f32.vlgmr.msra.gmra.mxu1 %v1850_v61 }
 0x370   :  { %2568 = vmatprep.mubr.msk.f32.mxu1 %vm1260_vm1, %v1859_v56 }
 0x373   :  { %1961 = vmatmul.mubr.f32.gmra.mxu1 %v1856_v52 }
 0x3c8   :  { %v1548_v1 = vpop.f32.mrf.mxu0 }
 0x3ca   :  { %v1550_v23 = vpop.f32.mrf.mxu0 }
 0x3cd   :  { %v1467_v2 = vpop.f32.mrf.mxu1 }
 0x3ce   :  { %v1549_v17 = vadd.f32 %v1548_v1, %v1467_v2 }
 0x3cf   :  { %v1469_v3 = vpop.f32.mrf.mxu1 }
 0x3da   :  { %v1553_v5 = vpop.f32.mrf.mxu0 }
 0x3dc   :  { %v1555_v6 = vpop.f32.mrf.mxu0 }
 0x3df   :  { %v1472_v7 = vpop.f32.mrf.mxu1 }
 0x3e0   :  { %v1554_v60 = vadd.f32 %v1553_v5, %v1472_v7 }
 0x3e1   :  { %v1474_v10 = vpop.f32.mrf.mxu1 }
 0x3fc   :  { %v1820_v11 = vpop.f32.mrf.mxu0 }
 0x3fe   :  { %v1822_v13 = vpop.f32.mrf.mxu0 }
 0x3ff   :  { %v1683_v15 = vpop.f32.mrf.mxu1 }
 0x400   :  { %v1692_v24 = vadd.f32 %v1683_v15, %v1549_v17 }
 0x401   :  { %v1825_v0 = vpop.f32.mrf.mxu0  ;;  %v1685_v18 = vpop.f32.mrf.mxu1 }
 0x402   :  { %v1829_v14 = vadd.f32 %v1820_v11, %v1692_v24 }
 0x403   :  { %v1827_v21 = vpop.f32.mrf.mxu0  ;;  %v1688_v19 = vpop.f32.mrf.mxu1 }
 0x404   :  { %v1693_v27 = vadd.f32 %v1688_v19, %v1554_v60 }
 0x405   :  { %v1690_v22 = vpop.f32.mrf.mxu1 }
 0x406   :  { %v1830_v16 = vadd.f32 %v1825_v0, %v1693_v27 }
 0x42f   :  { %v1957_v46 = vpop.f32.mrf.mxu1 }
 0x430   :  { %v1966_v26 = vadd.f32 %v1957_v46, %v1829_v14 }
 0x431   :  { %v1959_v29 = vpop.f32.mrf.mxu1 }
 0x432   :  { %v1975_v30 = vadd.f32 %v2569_v25, %v1966_v26 }
 0x433   :  { %v1962_v20 = vpop.f32.mrf.mxu1 }
 0x434   :  { %v1977_v33 = vmax.f32 %v1975_v30, 0.0  ;;  %v1967_v35 = vadd.f32 %v1962_v20, %v1830_v16 }
 0x435   :  { %v1964_v38 = vpop.f32.mrf.mxu1 }
 0x436   :  { %v1981_v40 = vcombine.high %v1977_v33, %v1977_v33  ;;  %v1988_v41 = vrot.slane %v1977_v33, %v3131_v4  ;;  %v1976_v9 = vadd.f32 %v2569_v25, %v1967_v35 }
 0x438   :  { %v1995_v32 = vrot.slane %v1981_v40, %v3131_v4  ;;  %v1978_v42 = vmax.f32 %v1976_v9, 0.0  ;;  %v2570_v43 = vrot.slane %v1988_v41, 9  ;;  %v1996_v45 = vcombine.high %v1988_v41, %v1988_v41  ;;  %v2222_v40 = vld [vmem:[%s3979_s5 + $0x58] sm:$0xff]  ;;  %v2220_v9 = vld [vmem:[%s3979_s5 + $0x48] sm:$0xff] }
 0x439   :  { %2594 = vmatpush3.msra.mxu0 %v2222_v40 }
 0x43a   :  { %v1998_v31 = vcombine.high %v1978_v42, %v1978_v42  ;;  %v2005_v47 = vrot.slane %v1978_v42, %v3131_v4  ;;  %v2047_v49 = vmax.f32 %v1988_v41, %v2570_v43  ;;  %v2571_v50 = vrot.slane %v1996_v45, 9  ;;  %v2221_v41 = vld [vmem:[%s3979_s5 + $0x50] sm:$0xff]  ;;  %2595 = vmatprep.subr.mxu0 %v2662_v8  ;;  %v2218_v42 = vld [vmem:[%s3979_s5 + $0x38] sm:$0xff] }
 0x43b   :  { %v2572_v51 = vrot.slane %v1995_v32, 9  ;;  %v1997_v63 = vcombine.high %v1995_v32, %v1995_v32  ;;  %2596 = vmatpush3.msra.mxu0 %v2221_v41  ;;  %v2217_v43 = vld [vmem:[%s3979_s5 + $0x30] sm:$0xff] }
 0x43c   :  { %v2012_v53 = vrot.slane %v1998_v31, %v3131_v4  ;;  %2063 = vrot.lane.b32.xlu0 %v2047_v49, %s2671_s4  ;;  %v2048_v54 = vmax.f32 %v1996_v45, %v2571_v50  ;;  %v2013_v55 = vcombine.high %v2005_v47, %v2005_v47  ;;  %v2574_v58 = vrot.slane %v2005_v47, 9  ;;  %2597 = vmatprep.subr.mxu0 %v2662_v8  ;;  %v2216_v45 = vld [vmem:[%s3979_s5 + $0x28] sm:$0xff]  ;;  %v2215_v31 = vld [vmem:[%s3979_s5 + $0x20] sm:$0xff] }
 0x43d   :  { %v2573_v12 = vrot.slane %v1997_v63, 9  ;;  %v2049_v57 = vmax.f32 %v1995_v32, %v2572_v51  ;;  %v2219_v32 = vld [vmem:[%s3979_s5 + $0x40] sm:$0xff]  ;;  %2598 = vmatpush3.msra.mxu0 %v2220_v9  ;;  %v2212_v50 = vld [vmem:[%s3979_s5 + $0x8] sm:$0xff] }
 0x43e   :  { %2065 = vrot.lane.b32.xlu1 %v2048_v54, %s2671_s4  ;;  %v2575_v37 = vrot.slane %v2013_v55, 9  ;;  %v2014_v59 = vcombine.high %v2012_v53, %v2012_v53  ;;  %v2051_v61 = vmax.f32 %v2005_v47, %v2574_v58  ;;  %v2576_v48 = vrot.slane %v2012_v53, 9  ;;  %2599 = vmatprep.subr.mxu0 %v2662_v8  ;;  %v2214_v47 = vld [vmem:[%s3979_s5 + $0x18] sm:$0xff] }
 0x43f   :  { %v2050_v36 = vmax.f32 %v1997_v63, %v2573_v12  ;;  %2600 = vmatpush3.msra.mxu0 %v2219_v32 }
 0x440   :  { %2067 = vrot.lane.b32.xlu0 %v2049_v57, %s2671_s4  ;;  %v2052_v4 = vmax.f32 %v2013_v55, %v2575_v37  ;;  %v2577_v62 = vrot.slane %v2014_v59, 9  ;;  %v2053_v56 = vmax.f32 %v2012_v53, %v2576_v48  ;;  %2601 = vmatprep.subr.mxu0 %v2662_v8 }
 0x441   :  { %2602 = vmatpush3.msra.mxu0 %v2218_v42 }
 0x442   :  { %2069 = vrot.lane.b32.xlu1 %v2050_v36, %s2671_s4  ;;  %v2054_v52 = vmax.f32 %v2014_v59, %v2577_v62  ;;  %2603 = vmatprep.subr.mxu0 %v2662_v8  ;;  %v2196_v59 = vsub.s32 3, %v3114_v28 }
 0x443   :  { %2604 = vmatpush3.msra.mxu0 %v2217_v43 }
 0x444   :  { %2071 = vrot.lane.b32.xlu0 %v2051_v61, %s2671_s4  ;;  %2605 = vmatprep.subr.mxu0 %v2662_v8 }
 0x445   :  { %2606 = vmatpush3.msra.mxu0 %v2216_v45 }
 0x446   :  { %2073 = vrot.lane.b32.xlu1 %v2052_v4, %s2671_s4  ;;  %2607 = vmatprep.subr.mxu0 %v2662_v8 }
 0x447   :  { %2608 = vmatpush3.msra.mxu0 %v2215_v31 }
 0x448   :  { %2075 = vrot.lane.b32.xlu0 %v2053_v56, %s2671_s4  ;;  %2609 = vmatprep.subr.mxu0 %v2662_v8 }
 0x449   :  { %2610 = vmatpush3.msra.mxu0 %v2214_v47 }
 0x44a   :  { %2077 = vrot.lane.b32.xlu1 %v2054_v52, %s2671_s4  ;;  %2611 = vmatprep.subr.mxu0 %v2662_v8 }
 0x4ae   :  { %v2064_v1 = vpop.permute.xlu0 %2063 }
 0x4af   :  { %v2087_v23 = vmax.f32 %v2047_v49, %v2064_v1  ;;  %v2213_v49 = vld [vmem:[%s3979_s5 + $0x10] sm:$0xff] }
 0x4b0   :  { %v2066_v2 = vpop.permute.xlu1 %2065  ;;  %2612 = vmatpush3.msra.mxu0 %v2213_v49 }
 0x4b1   :  { %v2088_v17 = vmax.f32 %v2048_v54, %v2066_v2  ;;  %v2106_v5 = vrot.slane %v2087_v23, %v3117_v34  ;;  %2613 = vmatprep.subr.mxu0 %v2662_v8  ;;  %v2211_v54 = vld [vmem:[%s3979_s5] sm:$0xff]  ;;  %s2675_s5 = smov 24  }
 0x4b2   :  { %v2068_v3 = vpop.permute.xlu0 %2067  ;;  %2614 = vmatpush3.msra.mxu0 %v2212_v50 }
 0x4b3   :  { %v2110_v6 = vrot.slane %v2088_v17, %v3117_v34  ;;  %v2089_v7 = vmax.f32 %v2049_v57, %v2068_v3  ;;  %2615 = vmatprep.subr.mxu0 %v2662_v8 }
 0x4b4   :  { %v2070_v60 = vpop.permute.xlu1 %2069  ;;  %2616 = vmatpush3.msra.mxu0 %v2211_v54 }
 0x4b5   :  { %v2135_v10 = vsel %vm1108_vm8, %v2110_v6, %v2106_v5  ;;  %v2114_v11 = vrot.slane %v2089_v7, %v3117_v34  ;;  %v2090_v13 = vmax.f32 %v2050_v36, %v2070_v60  ;;  %v2677_v6 = vmov 1966171168  }
 0x4b6   :  { %v2072_v15 = vpop.permute.xlu0 %2071  ;;  %v2305_v7 = vunpack.c.l.s4 %v2677_v6 }
 0x4b7   :  { %v2136_v0 = vsel %vm1110_vm9, %v2114_v11, %v2135_v10  ;;  %v2118_v18 = vrot.slane %v2090_v13, %v3117_v34  ;;  %v2091_v21 = vmax.f32 %v2051_v61, %v2072_v15  ;;  %vm2152_vm9 = vcmask 48128   ;;  %v2578_v10 = vld [vmem:[%s3980_s6] ss:$0 sm:$0xff] }
 0x4b8   :  { %v2074_v19 = vpop.permute.xlu1 %2073  ;;  %v2306_v60 = vunpack.c.0.s8 %v2305_v7 }
 0x4b9   :  { %v2137_v22 = vsel %vm1112_vm10, %v2118_v18, %v2136_v0  ;;  %v2122_v24 = vrot.slane %v2091_v21, %v3117_v34  ;;  %v2092_v27 = vmax.f32 %v2052_v4, %v2074_v19  ;;  %vm2154_vm10 = vcmask 97280  }
 0x4ba   :  { %v2076_v14 = vpop.permute.xlu0 %2075  ;;  %v2309_v11 = vsub.s32 %v2306_v60, %v3114_v28 }
 0x4bb   :  { %v2138_v46 = vsel %vm1114_vm12, %v2122_v24, %v2137_v22  ;;  %v2126_v25 = vrot.slane %v2092_v27, %v3117_v34  ;;  %v2093_v26 = vmax.f32 %v2053_v56, %v2076_v14  ;;  %vm2156_vm12 = vcmask 146432  }
 0x4bc   :  { %v2078_v29 = vpop.permute.xlu1 %2077 }
 0x4bd   :  { %v2139_v30 = vsel %vm1116_vm13, %v2126_v25, %v2138_v46  ;;  %v2130_v16 = vrot.slane %v2093_v26, %v3117_v34  ;;  %v2094_v20 = vmax.f32 %v2054_v52, %v2078_v29  ;;  %vm2674_vm13 = vmmov 0  }
 0x4be   :  { %2617 = vmatprep.mubr.msk.f32.mxu0 %vm2674_vm13, %v2662_v8 }
 0x4bf   :  { %v2134_v33 = vrot.slane %v2094_v20, %v3117_v34  ;;  %v2140_v35 = vsel %vm1118_vm14, %v2130_v16, %v2139_v30  ;;  %vm2206_vm14 = vcmask 195584  }
 0x4c1   :  { %v2141_v38 = vsel %vm1120_vm15, %v2134_v33, %v2140_v35  ;;  %vm2209_vm15 = vcmask 588800  }
 0x4c2   :  { %2146 = vrot.lane.b32.xlu1 %v2141_v38, %s2672_s29  ;;  %2143 = vrot.lane.b32.xlu0 %v2141_v38, %s2671_s4  ;;  %s2676_s29 = smov 72  }
 0x4c6   :  { %2149 = vrot.lane.b32.xlu0 %v2141_v38, %s2673_s30 }
 0x534   :  { %v2144_v51 = vpop.permute.xlu0 %2143  ;;  %v2147_v63 = vpop.permute.xlu1 %2146 }
 0x535   :  { %v2153_v53 = vsel %vm2152_vm9, %v2141_v38, %v2144_v51 }
 0x536   :  { %v2155_v55 = vsel %vm2154_vm10, %v2153_v53, %v2147_v63 }
 0x538   :  { %v2150_v12 = vpop.permute.xlu0 %2149 }
 0x539   :  { %v2157_v57 = vsel %vm2156_vm12, %v2155_v55, %v2150_v12 }
 0x53a   :  { %v2159_v58 = vcombine.high %v2157_v57, %v2157_v57  ;;  %v2163_v36 = vrot.slane %v2157_v57, %v3117_v34  ;;  %v2185_v37 = vrot.slane %v2157_v57, %v3210_v44  ;;  %v2173_v48 = vrot.slane %v2157_v57, %v3123_v39 }
 0x53b   :  { %v2197_v23 = vrot.slane %v2157_v57, %v2196_v59 }
 0x53c   :  { %v2189_v61 = vrot.slane %v2159_v58, %v3210_v44  ;;  %v2177_v4 = vrot.slane %v2159_v58, %v3123_v39  ;;  %v2167_v62 = vrot.slane %v2159_v58, %v3117_v34  ;;  %v2201_v52 = vrot.slane %v2159_v58, %v2196_v59 }
 0x53e   :  { %v2190_v8 = vsel %vm1108_vm8, %v2189_v61, %v2185_v37  ;;  %v2178_v56 = vsel %vm1108_vm8, %v2177_v4, %v2173_v48  ;;  %v2168_v1 = vsel %vm1108_vm8, %v2167_v62, %v2163_v36  ;;  %v2202_v44 = vsel %vm1108_vm8, %v2201_v52, %v2197_v23 }
 0x53f   :  { %2191 = vrot.lane.b32.xlu0 %v2190_v8, %s2669_s22  ;;  %2179 = vrot.lane.b32.xlu1 %v2178_v56, %s2675_s5  ;;  %vm2328_vm8 = vcmask 57344  }
 0x543   :  { %2203 = vrot.lane.b32.xlu1 %v2202_v44, %s2676_s29 }
 0x5b1   :  { %v2180_v39 = vpop.permute.xlu1 %2179  ;;  %v2192_v2 = vpop.permute.xlu0 %2191 }
 0x5b2   :  { %v2207_v34 = vsel %vm2206_vm14, %v2168_v1, %v2180_v39 }
 0x5b3   :  { %v2208_v3 = vsel %vm1257_vm0, %v2207_v34, %v2192_v2 }
 0x5b5   :  { %v2204_v17 = vpop.permute.xlu1 %2203 }
 0x5b6   :  { %v2210_v5 = vsel %vm2209_vm15, %v2208_v3, %v2204_v17 }
 0x5b7   :  { %2618 = vmatmul.mubr.msk.f32.vlgmr.msra.gmra.mxu0 %vm1265_vm2, %v2210_v5 }
 0x677   :  { %v2299_v13 = vpop.f32.mrf.mxu0 }
 0x678   :  { %v2300_v15 = vadd.f32 %v2578_v10, %v2299_v13 }
 0x679   :  { %v2619_v0 = vpop.f32.mrf.mxu0 }
 0x67a   :  { %v2310_v18 = vrot.slane %v2300_v15, %v2309_v11 }
 0x67c   :  { %v2311_v21 = vcombine.high %v2310_v18, %v2310_v18  ;;  %v2318_v19 = vrot.slane %v2310_v18, %v2309_v11 }
 0x67e   :  { %v2325_v22 = vrot.slane %v2311_v21, %v2309_v11  ;;  %2329 = vst.msk [vmem:[#allocation4] sm:$0x1] %vm2328_vm8, %v2318_v19 }
 0x680   :  { %2330 = vst.msk [vmem:[#allocation4 + $0x1] sm:$0x1] %vm2328_vm8, %v2325_v22 }
 0x681   :  { %2650 = shalt.err (!%p2647_p4)
}
 0x682   :  { %s2679_s6 = smov 1  }
 0x683   :  { %2342 = dma.vmem_to_hbm [thread:$0]  %s2337_s9, 32, %s3981_s7, [#allocation5], %s2670_s23, %s2670_s23, %s2679_s6  }
 0x684   :  { %2659 = dma.done.wait [#allocation5], 32  }
 0x685   :  { %2660 = vsyncadd [#allocation5], 4294967264 }
 0x686   :  { %2346 = vsyncpa [#allocation5], 1 }

</bundles_post_ra>
